<compile_context>
chip_gen: v6e
topology: v6e:2x2x1
jax: 0.10.0
libtpu: 0.0.40
codegen_flags: <defaults>
</compile_context>

<pallas_src>
import math
import functools

import jax
import jax.numpy as jnp
from jax.experimental import pallas as pl
from jax.experimental.pallas import tpu as pltpu


# -----------------------------------------------------------------------------
# Fused kernel: all LSTM layers (wavefront over time) + MLP head, one grid step.
# -----------------------------------------------------------------------------
def _fused_lstm_model_kernel(*refs, num_layers, seq_len, batch, hidden):
    T, B, H = seq_len, batch, hidden

    # refs = [x2] + [wih_t, whh_t, bias] * num_layers
    #        + [w1, b1, w2, b2, w3, b3] + [out_ref]
    x_ref = refs[0]
    lstm_refs = refs[1:1 + 3 * num_layers]
    (w1_ref, b1_ref, w2_ref, b2_ref,
     w3_ref, b3_ref) = refs[1 + 3 * num_layers:7 + 3 * num_layers]
    out_ref = refs[7 + 3 * num_layers]

    # Load weights into vregs once; they stay resident across the whole loop.
    wih = [None] * num_layers
    whh, bias = [], []
    for l in range(num_layers):
        wih_ref, whh_ref, b_ref = lstm_refs[3 * l:3 * l + 3]
        whh.append(whh_ref[...])             # (H, 4H)
        bias.append(b_ref[...])              # (1, 4H)
        if l >= 1:
            wih[l] = wih_ref[...]            # (H, 4H), used per-step

    # Hoisted (off the serial chain): layer-0 input projection for all T steps.
    xg0 = (jnp.dot(x_ref[...], lstm_refs[0][...],
                   preferred_element_type=jnp.float32)
           + bias[0])                        # (T*B, 4H)

    # Lane mask for the g-gate block; hoisted out of the loop.
    lane = jax.lax.broadcasted_iota(jnp.int32, (B, 4 * H), 1)
    is_g = jnp.logical_and(lane >= 2 * H, lane < 3 * H)

    def cell(gates, c_prev):
        # g-gate columns were pre-scaled x2 in prepare_params, so a single
        # full-width sigmoid gives every gate: tanh(x) == 2*sigmoid(2x) - 1.
        s = jax.nn.sigmoid(gates)                        # 1 EUP pass, 128 lanes
        act = jnp.where(is_g, 2.0 * s - 1.0, s)          # [sig i|sig f|tanh g|sig o]
        i_g = act[:, 0 * H:1 * H]
        f_g = act[:, 1 * H:2 * H]
        g_g = act[:, 2 * H:3 * H]
        o_g = act[:, 3 * H:4 * H]
        c_new = f_g * c_prev + i_g * g_g
        h_new = o_g * jnp.tanh(c_new)                    # 1 EUP pass
        return h_new, c_new

    h = [jnp.zeros((B, H), jnp.float32) for _ in range(num_layers)]
    c = [jnp.zeros((B, H), jnp.float32) for _ in range(num_layers)]

    # Wavefront-interleaved recurrence (fully unrolled, static indices).
    # Layer l @ t depends only on layer l-1 @ t and layer l @ t-1, so the
    # per-layer chains overlap; no concatenate, no per-layer sequence buffer.
    for t in range(T):
        g0 = (xg0[t * B:(t + 1) * B, :]
              + jnp.dot(h[0], whh[0], preferred_element_type=jnp.float32))
        h[0], c[0] = cell(g0, c[0])
        for l in range(1, num_layers):
            # h[l-1]@W_ih branches off layer l-1's chain; h[l]@W_hh depends
            # only on step t-1, so the two matmuls are independent.
            gl = (jnp.dot(h[l - 1], wih[l], preferred_element_type=jnp.float32)
                  + bias[l]
                  + jnp.dot(h[l], whh[l], preferred_element_type=jnp.float32))
            h[l], c[l] = cell(gl, c[l])

    # MLP head fused onto the final hidden state (h == out[:, -1, :]).
    # linear1/linear2 were zero-padded to 128 lanes -> everything lane-dense.
    h_last = h[num_layers - 1]
    z1 = jnp.tanh(
        jnp.dot(h_last, w1_ref[...], preferred_element_type=jnp.float32)
        + b1_ref[...])                                   # (B, 128) padded
    z2 = jax.nn.sigmoid(
        jnp.dot(z1, w2_ref[...], preferred_element_type=jnp.float32)
        + b2_ref[...])                                   # (B, output_size)
    out_ref[...] = (
        jnp.dot(z2, w3_ref[...], preferred_element_type=jnp.float32)
        + b3_ref[...])                                   # (B, 128)


# -----------------------------------------------------------------------------
# Parameters
# -----------------------------------------------------------------------------
def init_params(key, input_size, hidden_size, num_layers, output_size):
    """PyTorch-layout parameters with uniform(-1/sqrt(fan), 1/sqrt(fan)) init."""
    params = {"lstm": []}
    bound = 1.0 / math.sqrt(hidden_size)
    for layer in range(num_layers):
        in_sz = input_size if layer == 0 else hidden_size
        key, k1, k2, k3, k4 = jax.random.split(key, 5)
        params["lstm"].append({
            "w_ih": jax.random.uniform(k1, (4 * hidden_size, in_sz), jnp.float32, -bound, bound),
            "w_hh": jax.random.uniform(k2, (4 * hidden_size, hidden_size), jnp.float32, -bound, bound),
            "b_ih": jax.random.uniform(k3, (4 * hidden_size,), jnp.float32, -bound, bound),
            "b_hh": jax.random.uniform(k4, (4 * hidden_size,), jnp.float32, -bound, bound),
        })

    def linear(key, out_f, in_f):
        b = 1.0 / math.sqrt(in_f)
        k_w, k_b = jax.random.split(key)
        return (jax.random.uniform(k_w, (out_f, in_f), jnp.float32, -b, b),
                jax.random.uniform(k_b, (out_f,), jnp.float32, -b, b))

    key, kl1, kl2, kl3 = jax.random.split(key, 4)
    params["linear1"] = linear(kl1, hidden_size // 2, hidden_size)
    params["linear2"] = linear(kl2, output_size, hidden_size // 2)
    params["linear3"] = linear(kl3, 128, 128)
    return params


def prepare_params(params, lane_pad=128):
    """One-time conversion to kernel layout.

    * LSTM weights transposed, biases folded (b_ih + b_hh).
    * g-gate columns (block [2H, 3H) of the 4H axis) pre-scaled by 2 so the
      kernel recovers tanh(g) from one full-width sigmoid.
    * linear1 output / linear2 input zero-padded to 128 lanes (lane-dense head).
    """
    H = params["lstm"][0]["w_hh"].shape[1]
    g_scale = jnp.ones((4 * H,), jnp.float32).at[2 * H:3 * H].set(2.0)

    prepared = {"lstm": []}
    for p in params["lstm"]:
        prepared["lstm"].append({
            "wih_t": jnp.transpose(p["w_ih"]) * g_scale,           # (in, 4H)
            "whh_t": jnp.transpose(p["w_hh"]) * g_scale,           # (H, 4H)
            "bias": ((p["b_ih"] + p["b_hh"]) * g_scale)[None, :],  # (1, 4H)
        })

    w1, b1 = params["linear1"]          # (H//2, H), (H//2,)
    w2, b2 = params["linear2"]          # (out, H//2), (out,)
    w3, b3 = params["linear3"]          # (128, 128), (128,)
    hid2 = w1.shape[0]
    w1t = jnp.zeros((H, lane_pad), jnp.float32).at[:, :hid2].set(jnp.transpose(w1))
    b1p = jnp.zeros((1, lane_pad), jnp.float32).at[:, :hid2].set(b1[None, :])
    w2t = jnp.zeros((lane_pad, w2.shape[0]), jnp.float32).at[:hid2, :].set(jnp.transpose(w2))
    prepared["linear1"] = (w1t, b1p)
    prepared["linear2"] = (w2t, b2[None, :])
    prepared["linear3"] = (jnp.transpose(w3), b3[None, :])
    return prepared


# -----------------------------------------------------------------------------
# Forward pass (single pallas_call)
# -----------------------------------------------------------------------------
@jax.jit
def lstm_model_forward(x, kparams):
    """x: (B, T, input_size), batch_first like PyTorch.  Returns (B, 128)."""
    B, T, I = x.shape
    num_layers = len(kparams["lstm"])
    H = kparams["lstm"][0]["whh_t"].shape[0]
    assert kparams["linear3"][0].shape == (128, 128) and \
        kparams["linear2"][0].shape[1] == 128, (
        "linear3 is Linear(128, 128); output_size must be 128")

    # Pad the batch to a sublane multiple (8) so every (B, ...) tile is
    # unmasked; padded rows are row-independent and dropped after the call.
    Bp = max(8, ((B + 7) // 8) * 8)
    x_tm = jnp.transpose(x, (1, 0, 2))                       # (T, B, I)
    if Bp != B:
        x_tm = jnp.pad(x_tm, ((0, 0), (0, Bp - B), (0, 0)))
    x2 = x_tm.reshape(T * Bp, I)                             # time-major flat

    inputs = [x2]
    in_specs = [pl.BlockSpec((T * Bp, I), lambda i: (0, 0))]
    for p in kparams["lstm"]:
        for arr in (p["wih_t"], p["whh_t"], p["bias"]):
            inputs.append(arr)
            in_specs.append(pl.BlockSpec(arr.shape, lambda i: (0, 0)))
    for name in ("linear1", "linear2", "linear3"):
        w, b = kparams[name]
        inputs.extend([w, b])
        in_specs.append(pl.BlockSpec(w.shape, lambda i: (0, 0)))
        in_specs.append(pl.BlockSpec(b.shape, lambda i: (0, 0)))

    kernel = functools.partial(_fused_lstm_model_kernel,
                               num_layers=num_layers, seq_len=T,
                               batch=Bp, hidden=H)
    out = pl.pallas_call(
        kernel,
        out_shape=jax.ShapeDtypeStruct((Bp, 128), jnp.float32),
        grid_spec=pltpu.PrefetchScalarGridSpec(
            num_scalar_prefetch=0,
            grid=(1,),                     # whole model in one grid step
            in_specs=in_specs,
            out_specs=pl.BlockSpec((Bp, 128), lambda i: (0, 0)),
        ),
        compiler_params=pltpu.CompilerParams(
            dimension_semantics=("arbitrary",)),
    )(*inputs)
    return out[:B]


# -----------------------------------------------------------------------------
# Pure-JAX reference (correctness check only; uses original PyTorch layout)
# -----------------------------------------------------------------------------
def reference_forward(x, params):
    B = x.shape[0]
    h_seq = jnp.transpose(x, (1, 0, 2))
    for p in params["lstm"]:
        H = p["w_hh"].shape[1]
        h = jnp.zeros((B, H), jnp.float32)
        c = jnp.zeros((B, H), jnp.float32)
        outs = []
        for t in range(h_seq.shape[0]):
            gates = (h_seq[t] @ p["w_ih"].T + h @ p["w_hh"].T + p["b_ih"] + p["b_hh"])
            i_g = jax.nn.sigmoid(gates[:, 0 * H:1 * H])
            f_g = jax.nn.sigmoid(gates[:, 1 * H:2 * H])
            g_g = jnp.tanh(gates[:, 2 * H:3 * H])
            o_g = jax.nn.sigmoid(gates[:, 3 * H:4 * H])
            c = f_g * c + i_g * g_g
            h = o_g * jnp.tanh(c)
            outs.append(h)
        h_seq = jnp.stack(outs, axis=0)
    h_last = h_seq[-1]
    (w1, b1), (w2, b2), (w3, b3) = (params["linear1"], params["linear2"],
                                    params["linear3"])
    z1 = jnp.tanh(h_last @ w1.T + b1)
    z2 = jax.nn.sigmoid(z1 @ w2.T + b2)
    return z2 @ w3.T + b3


if __name__ == "__main__":
    # Small shapes consistent with the module; output_size must be 128 because
    # linear3 is Linear(128, 128) applied to linear2's output.
    B, T = 2, 8
    input_size, hidden_size, num_layers, output_size = 16, 32, 2, 128

    key = jax.random.PRNGKey(0)
    k_x, k_p = jax.random.split(key)
    x = jax.random.normal(k_x, (B, T, input_size), dtype=jnp.float32)
    params = init_params(k_p, input_size, hidden_size, num_layers, output_size)
    kparams = prepare_params(params)      # one-time layout conversion

    out = jax.block_until_ready(lstm_model_forward(x, kparams))
    assert out.shape == (B, 128), out.shape

    ref = jax.block_until_ready(reference_forward(x, params))
    # DEFAULT MXU precision (bf16 operand rounding, f32 accumulation) vs the
    # f32 XLA reference -> 2e-2 tolerance (deliberate trade-off; the recurrent
    # matmul could run at HIGHEST precision if f32-grade accuracy is required).
    assert jnp.allclose(out, ref, rtol=2e-2, atol=2e-2), (
        float(jnp.max(jnp.abs(out - ref))))

    print("KERNEL_OK")
</pallas_src>

<mosaic_0001>
module attributes {stable_mosaic.version = 11 : i64} {
  func.func @_fused_lstm_model_kernel(%arg0: i32, %arg1: memref<64x16xf32, #tpu.memory_space<vmem>>, %arg2: memref<16x128xf32, #tpu.memory_space<vmem>>, %arg3: memref<32x128xf32, #tpu.memory_space<vmem>>, %arg4: memref<1x128xf32, #tpu.memory_space<vmem>>, %arg5: memref<32x128xf32, #tpu.memory_space<vmem>>, %arg6: memref<32x128xf32, #tpu.memory_space<vmem>>, %arg7: memref<1x128xf32, #tpu.memory_space<vmem>>, %arg8: memref<32x128xf32, #tpu.memory_space<vmem>>, %arg9: memref<1x128xf32, #tpu.memory_space<vmem>>, %arg10: memref<128x128xf32, #tpu.memory_space<vmem>>, %arg11: memref<1x128xf32, #tpu.memory_space<vmem>>, %arg12: memref<128x128xf32, #tpu.memory_space<vmem>>, %arg13: memref<1x128xf32, #tpu.memory_space<vmem>>, %arg14: memref<8x128xf32, #tpu.memory_space<vmem>>) attributes {dimension_semantics = [#tpu.dimension_semantics<arbitrary>], iteration_bounds = array<i64: 1>, scalar_prefetch = 0 : i64, scratch_operands = 0 : i64, tpu.core_type = #tpu.core_type<tc>, window_params = [{pipeline_mode = #tpu.pipeline_mode<synchronous>, transform_indices = @transform_0, window_bounds = array<i64: 64, 16>}, {pipeline_mode = #tpu.pipeline_mode<synchronous>, transform_indices = @transform_1, window_bounds = array<i64: 16, 128>}, {pipeline_mode = #tpu.pipeline_mode<synchronous>, transform_indices = @transform_2, window_bounds = array<i64: 32, 128>}, {pipeline_mode = #tpu.pipeline_mode<synchronous>, transform_indices = @transform_3, window_bounds = array<i64: 1, 128>}, {pipeline_mode = #tpu.pipeline_mode<synchronous>, transform_indices = @transform_4, window_bounds = array<i64: 32, 128>}, {pipeline_mode = #tpu.pipeline_mode<synchronous>, transform_indices = @transform_5, window_bounds = array<i64: 32, 128>}, {pipeline_mode = #tpu.pipeline_mode<synchronous>, transform_indices = @transform_6, window_bounds = array<i64: 1, 128>}, {pipeline_mode = #tpu.pipeline_mode<synchronous>, transform_indices = @transform_7, window_bounds = array<i64: 32, 128>}, {pipeline_mode = #tpu.pipeline_mode<synchronous>, transform_indices = @transform_8, window_bounds = array<i64: 1, 128>}, {pipeline_mode = #tpu.pipeline_mode<synchronous>, transform_indices = @transform_9, window_bounds = array<i64: 128, 128>}, {pipeline_mode = #tpu.pipeline_mode<synchronous>, transform_indices = @transform_10, window_bounds = array<i64: 1, 128>}, {pipeline_mode = #tpu.pipeline_mode<synchronous>, transform_indices = @transform_11, window_bounds = array<i64: 128, 128>}, {pipeline_mode = #tpu.pipeline_mode<synchronous>, transform_indices = @transform_12, window_bounds = array<i64: 1, 128>}, {pipeline_mode = #tpu.pipeline_mode<synchronous>, transform_indices = @transform_13, window_bounds = array<i64: 8, 128>}]} {
    %c0 = arith.constant 0 : index
    %c0_0 = arith.constant 0 : index
    %0 = vector.load %arg3[%c0, %c0_0] : memref<32x128xf32, #tpu.memory_space<vmem>>, vector<32x128xf32>
    %c0_1 = arith.constant 0 : index
    %c0_2 = arith.constant 0 : index
    %1 = vector.load %arg4[%c0_1, %c0_2] : memref<1x128xf32, #tpu.memory_space<vmem>>, vector<1x128xf32>
    %c0_3 = arith.constant 0 : index
    %c0_4 = arith.constant 0 : index
    %2 = vector.load %arg6[%c0_3, %c0_4] : memref<32x128xf32, #tpu.memory_space<vmem>>, vector<32x128xf32>
    %c0_5 = arith.constant 0 : index
    %c0_6 = arith.constant 0 : index
    %3 = vector.load %arg7[%c0_5, %c0_6] : memref<1x128xf32, #tpu.memory_space<vmem>>, vector<1x128xf32>
    %c0_7 = arith.constant 0 : index
    %c0_8 = arith.constant 0 : index
    %4 = vector.load %arg5[%c0_7, %c0_8] : memref<32x128xf32, #tpu.memory_space<vmem>>, vector<32x128xf32>
    %c0_9 = arith.constant 0 : index
    %c0_10 = arith.constant 0 : index
    %5 = vector.load %arg1[%c0_9, %c0_10] : memref<64x16xf32, #tpu.memory_space<vmem>>, vector<64x16xf32>
    %c0_11 = arith.constant 0 : index
    %c0_12 = arith.constant 0 : index
    %6 = vector.load %arg2[%c0_11, %c0_12] : memref<16x128xf32, #tpu.memory_space<vmem>>, vector<16x128xf32>
    %cst = arith.constant dense<0.000000e+00> : vector<64x128xf32>
    %7 = tpu.matmul %5, %6, %cst {dimension_numbers = #tpu.dot_dimension_numbers<[1], [0], [0], [1], [0, 0, 1, 1], [], []>} : vector<64x16xf32>, vector<16x128xf32>, vector<64x128xf32> -> vector<64x128xf32>
    %8 = vector.broadcast %1 : vector<1x128xf32> to vector<64x128xf32>
    %9 = arith.addf %7, %8 : vector<64x128xf32>
    %10 = tpu.iota {dimensions = array<i32: 1>} : vector<8x128xi32>
    %c64_i32 = arith.constant 64 : i32
    %11 = vector.broadcast %c64_i32 : i32 to vector<8x128xi32>
    %12 = arith.cmpi sge, %10, %11 : vector<8x128xi32>
    %c96_i32 = arith.constant 96 : i32
    %13 = vector.broadcast %c96_i32 : i32 to vector<8x128xi32>
    %14 = arith.cmpi slt, %10, %13 : vector<8x128xi32>
    %15 = arith.andi %12, %14 : vector<8x128xi1>
    %cst_13 = arith.constant 0.000000e+00 : f32
    %16 = vector.broadcast %cst_13 : f32 to vector<8x32xf32>
    %cst_14 = arith.constant 0.000000e+00 : f32
    %17 = vector.broadcast %cst_14 : f32 to vector<8x32xf32>
    %cst_15 = arith.constant 0.000000e+00 : f32
    %18 = vector.broadcast %cst_15 : f32 to vector<8x32xf32>
    %cst_16 = arith.constant 0.000000e+00 : f32
    %19 = vector.broadcast %cst_16 : f32 to vector<8x32xf32>
    %20 = vector.extract_strided_slice %9 {offsets = [0, 0], sizes = [8, 128], strides = [1, 1]} : vector<64x128xf32> to vector<8x128xf32>
    %cst_17 = arith.constant dense<0.000000e+00> : vector<8x128xf32>
    %21 = tpu.matmul %16, %0, %cst_17 {dimension_numbers = #tpu.dot_dimension_numbers<[1], [0], [0], [1], [0, 0, 1, 1], [], []>} : vector<8x32xf32>, vector<32x128xf32>, vector<8x128xf32> -> vector<8x128xf32>
    %22 = arith.addf %20, %21 : vector<8x128xf32>
    %23 = arith.negf %22 : vector<8x128xf32>
    %24 = math.exp %23 : vector<8x128xf32>
    %cst_18 = arith.constant 1.000000e+00 : f32
    %25 = vector.broadcast %cst_18 : f32 to vector<8x128xf32>
    %26 = arith.addf %25, %24 : vector<8x128xf32>
    %27 = arith.divf %25, %26 : vector<8x128xf32>
    %cst_19 = arith.constant 2.000000e+00 : f32
    %28 = vector.broadcast %cst_19 : f32 to vector<8x128xf32>
    %29 = arith.mulf %28, %27 : vector<8x128xf32>
    %cst_20 = arith.constant 1.000000e+00 : f32
    %30 = vector.broadcast %cst_20 : f32 to vector<8x128xf32>
    %31 = arith.subf %29, %30 : vector<8x128xf32>
    %32 = arith.select %15, %31, %27 : vector<8x128xi1>, vector<8x128xf32>
    %33 = vector.extract_strided_slice %32 {offsets = [0, 0], sizes = [8, 32], strides = [1, 1]} : vector<8x128xf32> to vector<8x32xf32>
    %34 = vector.extract_strided_slice %32 {offsets = [0, 32], sizes = [8, 32], strides = [1, 1]} : vector<8x128xf32> to vector<8x32xf32>
    %35 = vector.extract_strided_slice %32 {offsets = [0, 64], sizes = [8, 32], strides = [1, 1]} : vector<8x128xf32> to vector<8x32xf32>
    %36 = vector.extract_strided_slice %32 {offsets = [0, 96], sizes = [8, 32], strides = [1, 1]} : vector<8x128xf32> to vector<8x32xf32>
    %37 = arith.mulf %34, %18 : vector<8x32xf32>
    %38 = arith.mulf %33, %35 : vector<8x32xf32>
    %39 = arith.addf %37, %38 : vector<8x32xf32>
    %40 = math.tanh %39 : vector<8x32xf32>
    %41 = arith.mulf %36, %40 : vector<8x32xf32>
    %cst_21 = arith.constant dense<0.000000e+00> : vector<8x128xf32>
    %42 = tpu.matmul %41, %4, %cst_21 {dimension_numbers = #tpu.dot_dimension_numbers<[1], [0], [0], [1], [0, 0, 1, 1], [], []>} : vector<8x32xf32>, vector<32x128xf32>, vector<8x128xf32> -> vector<8x128xf32>
    %43 = vector.broadcast %3 : vector<1x128xf32> to vector<8x128xf32>
    %44 = arith.addf %42, %43 : vector<8x128xf32>
    %cst_22 = arith.constant dense<0.000000e+00> : vector<8x128xf32>
    %45 = tpu.matmul %17, %2, %cst_22 {dimension_numbers = #tpu.dot_dimension_numbers<[1], [0], [0], [1], [0, 0, 1, 1], [], []>} : vector<8x32xf32>, vector<32x128xf32>, vector<8x128xf32> -> vector<8x128xf32>
    %46 = arith.addf %44, %45 : vector<8x128xf32>
    %47 = arith.negf %46 : vector<8x128xf32>
    %48 = math.exp %47 : vector<8x128xf32>
    %cst_23 = arith.constant 1.000000e+00 : f32
    %49 = vector.broadcast %cst_23 : f32 to vector<8x128xf32>
    %50 = arith.addf %49, %48 : vector<8x128xf32>
    %51 = arith.divf %49, %50 : vector<8x128xf32>
    %cst_24 = arith.constant 2.000000e+00 : f32
    %52 = vector.broadcast %cst_24 : f32 to vector<8x128xf32>
    %53 = arith.mulf %52, %51 : vector<8x128xf32>
    %cst_25 = arith.constant 1.000000e+00 : f32
    %54 = vector.broadcast %cst_25 : f32 to vector<8x128xf32>
    %55 = arith.subf %53, %54 : vector<8x128xf32>
    %56 = arith.select %15, %55, %51 : vector<8x128xi1>, vector<8x128xf32>
    %57 = vector.extract_strided_slice %56 {offsets = [0, 0], sizes = [8, 32], strides = [1, 1]} : vector<8x128xf32> to vector<8x32xf32>
    %58 = vector.extract_strided_slice %56 {offsets = [0, 32], sizes = [8, 32], strides = [1, 1]} : vector<8x128xf32> to vector<8x32xf32>
    %59 = vector.extract_strided_slice %56 {offsets = [0, 64], sizes = [8, 32], strides = [1, 1]} : vector<8x128xf32> to vector<8x32xf32>
    %60 = vector.extract_strided_slice %56 {offsets = [0, 96], sizes = [8, 32], strides = [1, 1]} : vector<8x128xf32> to vector<8x32xf32>
    %61 = arith.mulf %58, %19 : vector<8x32xf32>
    %62 = arith.mulf %57, %59 : vector<8x32xf32>
    %63 = arith.addf %61, %62 : vector<8x32xf32>
    %64 = math.tanh %63 : vector<8x32xf32>
    %65 = arith.mulf %60, %64 : vector<8x32xf32>
    %66 = vector.extract_strided_slice %9 {offsets = [8, 0], sizes = [8, 128], strides = [1, 1]} : vector<64x128xf32> to vector<8x128xf32>
    %cst_26 = arith.constant dense<0.000000e+00> : vector<8x128xf32>
    %67 = tpu.matmul %41, %0, %cst_26 {dimension_numbers = #tpu.dot_dimension_numbers<[1], [0], [0], [1], [0, 0, 1, 1], [], []>} : vector<8x32xf32>, vector<32x128xf32>, vector<8x128xf32> -> vector<8x128xf32>
    %68 = arith.addf %66, %67 : vector<8x128xf32>
    %69 = arith.negf %68 : vector<8x128xf32>
    %70 = math.exp %69 : vector<8x128xf32>
    %cst_27 = arith.constant 1.000000e+00 : f32
    %71 = vector.broadcast %cst_27 : f32 to vector<8x128xf32>
    %72 = arith.addf %71, %70 : vector<8x128xf32>
    %73 = arith.divf %71, %72 : vector<8x128xf32>
    %cst_28 = arith.constant 2.000000e+00 : f32
    %74 = vector.broadcast %cst_28 : f32 to vector<8x128xf32>
    %75 = arith.mulf %74, %73 : vector<8x128xf32>
    %cst_29 = arith.constant 1.000000e+00 : f32
    %76 = vector.broadcast %cst_29 : f32 to vector<8x128xf32>
    %77 = arith.subf %75, %76 : vector<8x128xf32>
    %78 = arith.select %15, %77, %73 : vector<8x128xi1>, vector<8x128xf32>
    %79 = vector.extract_strided_slice %78 {offsets = [0, 0], sizes = [8, 32], strides = [1, 1]} : vector<8x128xf32> to vector<8x32xf32>
    %80 = vector.extract_strided_slice %78 {offsets = [0, 32], sizes = [8, 32], strides = [1, 1]} : vector<8x128xf32> to vector<8x32xf32>
    %81 = vector.extract_strided_slice %78 {offsets = [0, 64], sizes = [8, 32], strides = [1, 1]} : vector<8x128xf32> to vector<8x32xf32>
    %82 = vector.extract_strided_slice %78 {offsets = [0, 96], sizes = [8, 32], strides = [1, 1]} : vector<8x128xf32> to vector<8x32xf32>
    %83 = arith.mulf %80, %39 : vector<8x32xf32>
    %84 = arith.mulf %79, %81 : vector<8x32xf32>
    %85 = arith.addf %83, %84 : vector<8x32xf32>
    %86 = math.tanh %85 : vector<8x32xf32>
    %87 = arith.mulf %82, %86 : vector<8x32xf32>
    %cst_30 = arith.constant dense<0.000000e+00> : vector<8x128xf32>
    %88 = tpu.matmul %87, %4, %cst_30 {dimension_numbers = #tpu.dot_dimension_numbers<[1], [0], [0], [1], [0, 0, 1, 1], [], []>} : vector<8x32xf32>, vector<32x128xf32>, vector<8x128xf32> -> vector<8x128xf32>
    %89 = vector.broadcast %3 : vector<1x128xf32> to vector<8x128xf32>
    %90 = arith.addf %88, %89 : vector<8x128xf32>
    %cst_31 = arith.constant dense<0.000000e+00> : vector<8x128xf32>
    %91 = tpu.matmul %65, %2, %cst_31 {dimension_numbers = #tpu.dot_dimension_numbers<[1], [0], [0], [1], [0, 0, 1, 1], [], []>} : vector<8x32xf32>, vector<32x128xf32>, vector<8x128xf32> -> vector<8x128xf32>
    %92 = arith.addf %90, %91 : vector<8x128xf32>
    %93 = arith.negf %92 : vector<8x128xf32>
    %94 = math.exp %93 : vector<8x128xf32>
    %cst_32 = arith.constant 1.000000e+00 : f32
    %95 = vector.broadcast %cst_32 : f32 to vector<8x128xf32>
    %96 = arith.addf %95, %94 : vector<8x128xf32>
    %97 = arith.divf %95, %96 : vector<8x128xf32>
    %cst_33 = arith.constant 2.000000e+00 : f32
    %98 = vector.broadcast %cst_33 : f32 to vector<8x128xf32>
    %99 = arith.mulf %98, %97 : vector<8x128xf32>
    %cst_34 = arith.constant 1.000000e+00 : f32
    %100 = vector.broadcast %cst_34 : f32 to vector<8x128xf32>
    %101 = arith.subf %99, %100 : vector<8x128xf32>
    %102 = arith.select %15, %101, %97 : vector<8x128xi1>, vector<8x128xf32>
    %103 = vector.extract_strided_slice %102 {offsets = [0, 0], sizes = [8, 32], strides = [1, 1]} : vector<8x128xf32> to vector<8x32xf32>
    %104 = vector.extract_strided_slice %102 {offsets = [0, 32], sizes = [8, 32], strides = [1, 1]} : vector<8x128xf32> to vector<8x32xf32>
    %105 = vector.extract_strided_slice %102 {offsets = [0, 64], sizes = [8, 32], strides = [1, 1]} : vector<8x128xf32> to vector<8x32xf32>
    %106 = vector.extract_strided_slice %102 {offsets = [0, 96], sizes = [8, 32], strides = [1, 1]} : vector<8x128xf32> to vector<8x32xf32>
    %107 = arith.mulf %104, %63 : vector<8x32xf32>
    %108 = arith.mulf %103, %105 : vector<8x32xf32>
    %109 = arith.addf %107, %108 : vector<8x32xf32>
    %110 = math.tanh %109 : vector<8x32xf32>
    %111 = arith.mulf %106, %110 : vector<8x32xf32>
    %112 = vector.extract_strided_slice %9 {offsets = [16, 0], sizes = [8, 128], strides = [1, 1]} : vector<64x128xf32> to vector<8x128xf32>
    %cst_35 = arith.constant dense<0.000000e+00> : vector<8x128xf32>
    %113 = tpu.matmul %87, %0, %cst_35 {dimension_numbers = #tpu.dot_dimension_numbers<[1], [0], [0], [1], [0, 0, 1, 1], [], []>} : vector<8x32xf32>, vector<32x128xf32>, vector<8x128xf32> -> vector<8x128xf32>
    %114 = arith.addf %112, %113 : vector<8x128xf32>
    %115 = arith.negf %114 : vector<8x128xf32>
    %116 = math.exp %115 : vector<8x128xf32>
    %cst_36 = arith.constant 1.000000e+00 : f32
    %117 = vector.broadcast %cst_36 : f32 to vector<8x128xf32>
    %118 = arith.addf %117, %116 : vector<8x128xf32>
    %119 = arith.divf %117, %118 : vector<8x128xf32>
    %cst_37 = arith.constant 2.000000e+00 : f32
    %120 = vector.broadcast %cst_37 : f32 to vector<8x128xf32>
    %121 = arith.mulf %120, %119 : vector<8x128xf32>
    %cst_38 = arith.constant 1.000000e+00 : f32
    %122 = vector.broadcast %cst_38 : f32 to vector<8x128xf32>
    %123 = arith.subf %121, %122 : vector<8x128xf32>
    %124 = arith.select %15, %123, %119 : vector<8x128xi1>, vector<8x128xf32>
    %125 = vector.extract_strided_slice %124 {offsets = [0, 0], sizes = [8, 32], strides = [1, 1]} : vector<8x128xf32> to vector<8x32xf32>
    %126 = vector.extract_strided_slice %124 {offsets = [0, 32], sizes = [8, 32], strides = [1, 1]} : vector<8x128xf32> to vector<8x32xf32>
    %127 = vector.extract_strided_slice %124 {offsets = [0, 64], sizes = [8, 32], strides = [1, 1]} : vector<8x128xf32> to vector<8x32xf32>
    %128 = vector.extract_strided_slice %124 {offsets = [0, 96], sizes = [8, 32], strides = [1, 1]} : vector<8x128xf32> to vector<8x32xf32>
    %129 = arith.mulf %126, %85 : vector<8x32xf32>
    %130 = arith.mulf %125, %127 : vector<8x32xf32>
    %131 = arith.addf %129, %130 : vector<8x32xf32>
    %132 = math.tanh %131 : vector<8x32xf32>
    %133 = arith.mulf %128, %132 : vector<8x32xf32>
    %cst_39 = arith.constant dense<0.000000e+00> : vector<8x128xf32>
    %134 = tpu.matmul %133, %4, %cst_39 {dimension_numbers = #tpu.dot_dimension_numbers<[1], [0], [0], [1], [0, 0, 1, 1], [], []>} : vector<8x32xf32>, vector<32x128xf32>, vector<8x128xf32> -> vector<8x128xf32>
    %135 = vector.broadcast %3 : vector<1x128xf32> to vector<8x128xf32>
    %136 = arith.addf %134, %135 : vector<8x128xf32>
    %cst_40 = arith.constant dense<0.000000e+00> : vector<8x128xf32>
    %137 = tpu.matmul %111, %2, %cst_40 {dimension_numbers = #tpu.dot_dimension_numbers<[1], [0], [0], [1], [0, 0, 1, 1], [], []>} : vector<8x32xf32>, vector<32x128xf32>, vector<8x128xf32> -> vector<8x128xf32>
    %138 = arith.addf %136, %137 : vector<8x128xf32>
    %139 = arith.negf %138 : vector<8x128xf32>
    %140 = math.exp %139 : vector<8x128xf32>
    %cst_41 = arith.constant 1.000000e+00 : f32
    %141 = vector.broadcast %cst_41 : f32 to vector<8x128xf32>
    %142 = arith.addf %141, %140 : vector<8x128xf32>
    %143 = arith.divf %141, %142 : vector<8x128xf32>
    %cst_42 = arith.constant 2.000000e+00 : f32
    %144 = vector.broadcast %cst_42 : f32 to vector<8x128xf32>
    %145 = arith.mulf %144, %143 : vector<8x128xf32>
    %cst_43 = arith.constant 1.000000e+00 : f32
    %146 = vector.broadcast %cst_43 : f32 to vector<8x128xf32>
    %147 = arith.subf %145, %146 : vector<8x128xf32>
    %148 = arith.select %15, %147, %143 : vector<8x128xi1>, vector<8x128xf32>
    %149 = vector.extract_strided_slice %148 {offsets = [0, 0], sizes = [8, 32], strides = [1, 1]} : vector<8x128xf32> to vector<8x32xf32>
    %150 = vector.extract_strided_slice %148 {offsets = [0, 32], sizes = [8, 32], strides = [1, 1]} : vector<8x128xf32> to vector<8x32xf32>
    %151 = vector.extract_strided_slice %148 {offsets = [0, 64], sizes = [8, 32], strides = [1, 1]} : vector<8x128xf32> to vector<8x32xf32>
    %152 = vector.extract_strided_slice %148 {offsets = [0, 96], sizes = [8, 32], strides = [1, 1]} : vector<8x128xf32> to vector<8x32xf32>
    %153 = arith.mulf %150, %109 : vector<8x32xf32>
    %154 = arith.mulf %149, %151 : vector<8x32xf32>
    %155 = arith.addf %153, %154 : vector<8x32xf32>
    %156 = math.tanh %155 : vector<8x32xf32>
    %157 = arith.mulf %152, %156 : vector<8x32xf32>
    %158 = vector.extract_strided_slice %9 {offsets = [24, 0], sizes = [8, 128], strides = [1, 1]} : vector<64x128xf32> to vector<8x128xf32>
    %cst_44 = arith.constant dense<0.000000e+00> : vector<8x128xf32>
    %159 = tpu.matmul %133, %0, %cst_44 {dimension_numbers = #tpu.dot_dimension_numbers<[1], [0], [0], [1], [0, 0, 1, 1], [], []>} : vector<8x32xf32>, vector<32x128xf32>, vector<8x128xf32> -> vector<8x128xf32>
    %160 = arith.addf %158, %159 : vector<8x128xf32>
    %161 = arith.negf %160 : vector<8x128xf32>
    %162 = math.exp %161 : vector<8x128xf32>
    %cst_45 = arith.constant 1.000000e+00 : f32
    %163 = vector.broadcast %cst_45 : f32 to vector<8x128xf32>
    %164 = arith.addf %163, %162 : vector<8x128xf32>
    %165 = arith.divf %163, %164 : vector<8x128xf32>
    %cst_46 = arith.constant 2.000000e+00 : f32
    %166 = vector.broadcast %cst_46 : f32 to vector<8x128xf32>
    %167 = arith.mulf %166, %165 : vector<8x128xf32>
    %cst_47 = arith.constant 1.000000e+00 : f32
    %168 = vector.broadcast %cst_47 : f32 to vector<8x128xf32>
    %169 = arith.subf %167, %168 : vector<8x128xf32>
    %170 = arith.select %15, %169, %165 : vector<8x128xi1>, vector<8x128xf32>
    %171 = vector.extract_strided_slice %170 {offsets = [0, 0], sizes = [8, 32], strides = [1, 1]} : vector<8x128xf32> to vector<8x32xf32>
    %172 = vector.extract_strided_slice %170 {offsets = [0, 32], sizes = [8, 32], strides = [1, 1]} : vector<8x128xf32> to vector<8x32xf32>
    %173 = vector.extract_strided_slice %170 {offsets = [0, 64], sizes = [8, 32], strides = [1, 1]} : vector<8x128xf32> to vector<8x32xf32>
    %174 = vector.extract_strided_slice %170 {offsets = [0, 96], sizes = [8, 32], strides = [1, 1]} : vector<8x128xf32> to vector<8x32xf32>
    %175 = arith.mulf %172, %131 : vector<8x32xf32>
    %176 = arith.mulf %171, %173 : vector<8x32xf32>
    %177 = arith.addf %175, %176 : vector<8x32xf32>
    %178 = math.tanh %177 : vector<8x32xf32>
    %179 = arith.mulf %174, %178 : vector<8x32xf32>
    %cst_48 = arith.constant dense<0.000000e+00> : vector<8x128xf32>
    %180 = tpu.matmul %179, %4, %cst_48 {dimension_numbers = #tpu.dot_dimension_numbers<[1], [0], [0], [1], [0, 0, 1, 1], [], []>} : vector<8x32xf32>, vector<32x128xf32>, vector<8x128xf32> -> vector<8x128xf32>
    %181 = vector.broadcast %3 : vector<1x128xf32> to vector<8x128xf32>
    %182 = arith.addf %180, %181 : vector<8x128xf32>
    %cst_49 = arith.constant dense<0.000000e+00> : vector<8x128xf32>
    %183 = tpu.matmul %157, %2, %cst_49 {dimension_numbers = #tpu.dot_dimension_numbers<[1], [0], [0], [1], [0, 0, 1, 1], [], []>} : vector<8x32xf32>, vector<32x128xf32>, vector<8x128xf32> -> vector<8x128xf32>
    %184 = arith.addf %182, %183 : vector<8x128xf32>
    %185 = arith.negf %184 : vector<8x128xf32>
    %186 = math.exp %185 : vector<8x128xf32>
    %cst_50 = arith.constant 1.000000e+00 : f32
    %187 = vector.broadcast %cst_50 : f32 to vector<8x128xf32>
    %188 = arith.addf %187, %186 : vector<8x128xf32>
    %189 = arith.divf %187, %188 : vector<8x128xf32>
    %cst_51 = arith.constant 2.000000e+00 : f32
    %190 = vector.broadcast %cst_51 : f32 to vector<8x128xf32>
    %191 = arith.mulf %190, %189 : vector<8x128xf32>
    %cst_52 = arith.constant 1.000000e+00 : f32
    %192 = vector.broadcast %cst_52 : f32 to vector<8x128xf32>
    %193 = arith.subf %191, %192 : vector<8x128xf32>
    %194 = arith.select %15, %193, %189 : vector<8x128xi1>, vector<8x128xf32>
    %195 = vector.extract_strided_slice %194 {offsets = [0, 0], sizes = [8, 32], strides = [1, 1]} : vector<8x128xf32> to vector<8x32xf32>
    %196 = vector.extract_strided_slice %194 {offsets = [0, 32], sizes = [8, 32], strides = [1, 1]} : vector<8x128xf32> to vector<8x32xf32>
    %197 = vector.extract_strided_slice %194 {offsets = [0, 64], sizes = [8, 32], strides = [1, 1]} : vector<8x128xf32> to vector<8x32xf32>
    %198 = vector.extract_strided_slice %194 {offsets = [0, 96], sizes = [8, 32], strides = [1, 1]} : vector<8x128xf32> to vector<8x32xf32>
    %199 = arith.mulf %196, %155 : vector<8x32xf32>
    %200 = arith.mulf %195, %197 : vector<8x32xf32>
    %201 = arith.addf %199, %200 : vector<8x32xf32>
    %202 = math.tanh %201 : vector<8x32xf32>
    %203 = arith.mulf %198, %202 : vector<8x32xf32>
    %204 = vector.extract_strided_slice %9 {offsets = [32, 0], sizes = [8, 128], strides = [1, 1]} : vector<64x128xf32> to vector<8x128xf32>
    %cst_53 = arith.constant dense<0.000000e+00> : vector<8x128xf32>
    %205 = tpu.matmul %179, %0, %cst_53 {dimension_numbers = #tpu.dot_dimension_numbers<[1], [0], [0], [1], [0, 0, 1, 1], [], []>} : vector<8x32xf32>, vector<32x128xf32>, vector<8x128xf32> -> vector<8x128xf32>
    %206 = arith.addf %204, %205 : vector<8x128xf32>
    %207 = arith.negf %206 : vector<8x128xf32>
    %208 = math.exp %207 : vector<8x128xf32>
    %cst_54 = arith.constant 1.000000e+00 : f32
    %209 = vector.broadcast %cst_54 : f32 to vector<8x128xf32>
    %210 = arith.addf %209, %208 : vector<8x128xf32>
    %211 = arith.divf %209, %210 : vector<8x128xf32>
    %cst_55 = arith.constant 2.000000e+00 : f32
    %212 = vector.broadcast %cst_55 : f32 to vector<8x128xf32>
    %213 = arith.mulf %212, %211 : vector<8x128xf32>
    %cst_56 = arith.constant 1.000000e+00 : f32
    %214 = vector.broadcast %cst_56 : f32 to vector<8x128xf32>
    %215 = arith.subf %213, %214 : vector<8x128xf32>
    %216 = arith.select %15, %215, %211 : vector<8x128xi1>, vector<8x128xf32>
    %217 = vector.extract_strided_slice %216 {offsets = [0, 0], sizes = [8, 32], strides = [1, 1]} : vector<8x128xf32> to vector<8x32xf32>
    %218 = vector.extract_strided_slice %216 {offsets = [0, 32], sizes = [8, 32], strides = [1, 1]} : vector<8x128xf32> to vector<8x32xf32>
    %219 = vector.extract_strided_slice %216 {offsets = [0, 64], sizes = [8, 32], strides = [1, 1]} : vector<8x128xf32> to vector<8x32xf32>
    %220 = vector.extract_strided_slice %216 {offsets = [0, 96], sizes = [8, 32], strides = [1, 1]} : vector<8x128xf32> to vector<8x32xf32>
    %221 = arith.mulf %218, %177 : vector<8x32xf32>
    %222 = arith.mulf %217, %219 : vector<8x32xf32>
    %223 = arith.addf %221, %222 : vector<8x32xf32>
    %224 = math.tanh %223 : vector<8x32xf32>
    %225 = arith.mulf %220, %224 : vector<8x32xf32>
    %cst_57 = arith.constant dense<0.000000e+00> : vector<8x128xf32>
    %226 = tpu.matmul %225, %4, %cst_57 {dimension_numbers = #tpu.dot_dimension_numbers<[1], [0], [0], [1], [0, 0, 1, 1], [], []>} : vector<8x32xf32>, vector<32x128xf32>, vector<8x128xf32> -> vector<8x128xf32>
    %227 = vector.broadcast %3 : vector<1x128xf32> to vector<8x128xf32>
    %228 = arith.addf %226, %227 : vector<8x128xf32>
    %cst_58 = arith.constant dense<0.000000e+00> : vector<8x128xf32>
    %229 = tpu.matmul %203, %2, %cst_58 {dimension_numbers = #tpu.dot_dimension_numbers<[1], [0], [0], [1], [0, 0, 1, 1], [], []>} : vector<8x32xf32>, vector<32x128xf32>, vector<8x128xf32> -> vector<8x128xf32>
    %230 = arith.addf %228, %229 : vector<8x128xf32>
    %231 = arith.negf %230 : vector<8x128xf32>
    %232 = math.exp %231 : vector<8x128xf32>
    %cst_59 = arith.constant 1.000000e+00 : f32
    %233 = vector.broadcast %cst_59 : f32 to vector<8x128xf32>
    %234 = arith.addf %233, %232 : vector<8x128xf32>
    %235 = arith.divf %233, %234 : vector<8x128xf32>
    %cst_60 = arith.constant 2.000000e+00 : f32
    %236 = vector.broadcast %cst_60 : f32 to vector<8x128xf32>
    %237 = arith.mulf %236, %235 : vector<8x128xf32>
    %cst_61 = arith.constant 1.000000e+00 : f32
    %238 = vector.broadcast %cst_61 : f32 to vector<8x128xf32>
    %239 = arith.subf %237, %238 : vector<8x128xf32>
    %240 = arith.select %15, %239, %235 : vector<8x128xi1>, vector<8x128xf32>
    %241 = vector.extract_strided_slice %240 {offsets = [0, 0], sizes = [8, 32], strides = [1, 1]} : vector<8x128xf32> to vector<8x32xf32>
    %242 = vector.extract_strided_slice %240 {offsets = [0, 32], sizes = [8, 32], strides = [1, 1]} : vector<8x128xf32> to vector<8x32xf32>
    %243 = vector.extract_strided_slice %240 {offsets = [0, 64], sizes = [8, 32], strides = [1, 1]} : vector<8x128xf32> to vector<8x32xf32>
    %244 = vector.extract_strided_slice %240 {offsets = [0, 96], sizes = [8, 32], strides = [1, 1]} : vector<8x128xf32> to vector<8x32xf32>
    %245 = arith.mulf %242, %201 : vector<8x32xf32>
    %246 = arith.mulf %241, %243 : vector<8x32xf32>
    %247 = arith.addf %245, %246 : vector<8x32xf32>
    %248 = math.tanh %247 : vector<8x32xf32>
    %249 = arith.mulf %244, %248 : vector<8x32xf32>
    %250 = vector.extract_strided_slice %9 {offsets = [40, 0], sizes = [8, 128], strides = [1, 1]} : vector<64x128xf32> to vector<8x128xf32>
    %cst_62 = arith.constant dense<0.000000e+00> : vector<8x128xf32>
    %251 = tpu.matmul %225, %0, %cst_62 {dimension_numbers = #tpu.dot_dimension_numbers<[1], [0], [0], [1], [0, 0, 1, 1], [], []>} : vector<8x32xf32>, vector<32x128xf32>, vector<8x128xf32> -> vector<8x128xf32>
    %252 = arith.addf %250, %251 : vector<8x128xf32>
    %253 = arith.negf %252 : vector<8x128xf32>
    %254 = math.exp %253 : vector<8x128xf32>
    %cst_63 = arith.constant 1.000000e+00 : f32
    %255 = vector.broadcast %cst_63 : f32 to vector<8x128xf32>
    %256 = arith.addf %255, %254 : vector<8x128xf32>
    %257 = arith.divf %255, %256 : vector<8x128xf32>
    %cst_64 = arith.constant 2.000000e+00 : f32
    %258 = vector.broadcast %cst_64 : f32 to vector<8x128xf32>
    %259 = arith.mulf %258, %257 : vector<8x128xf32>
    %cst_65 = arith.constant 1.000000e+00 : f32
    %260 = vector.broadcast %cst_65 : f32 to vector<8x128xf32>
    %261 = arith.subf %259, %260 : vector<8x128xf32>
    %262 = arith.select %15, %261, %257 : vector<8x128xi1>, vector<8x128xf32>
    %263 = vector.extract_strided_slice %262 {offsets = [0, 0], sizes = [8, 32], strides = [1, 1]} : vector<8x128xf32> to vector<8x32xf32>
    %264 = vector.extract_strided_slice %262 {offsets = [0, 32], sizes = [8, 32], strides = [1, 1]} : vector<8x128xf32> to vector<8x32xf32>
    %265 = vector.extract_strided_slice %262 {offsets = [0, 64], sizes = [8, 32], strides = [1, 1]} : vector<8x128xf32> to vector<8x32xf32>
    %266 = vector.extract_strided_slice %262 {offsets = [0, 96], sizes = [8, 32], strides = [1, 1]} : vector<8x128xf32> to vector<8x32xf32>
    %267 = arith.mulf %264, %223 : vector<8x32xf32>
    %268 = arith.mulf %263, %265 : vector<8x32xf32>
    %269 = arith.addf %267, %268 : vector<8x32xf32>
    %270 = math.tanh %269 : vector<8x32xf32>
    %271 = arith.mulf %266, %270 : vector<8x32xf32>
    %cst_66 = arith.constant dense<0.000000e+00> : vector<8x128xf32>
    %272 = tpu.matmul %271, %4, %cst_66 {dimension_numbers = #tpu.dot_dimension_numbers<[1], [0], [0], [1], [0, 0, 1, 1], [], []>} : vector<8x32xf32>, vector<32x128xf32>, vector<8x128xf32> -> vector<8x128xf32>
    %273 = vector.broadcast %3 : vector<1x128xf32> to vector<8x128xf32>
    %274 = arith.addf %272, %273 : vector<8x128xf32>
    %cst_67 = arith.constant dense<0.000000e+00> : vector<8x128xf32>
    %275 = tpu.matmul %249, %2, %cst_67 {dimension_numbers = #tpu.dot_dimension_numbers<[1], [0], [0], [1], [0, 0, 1, 1], [], []>} : vector<8x32xf32>, vector<32x128xf32>, vector<8x128xf32> -> vector<8x128xf32>
    %276 = arith.addf %274, %275 : vector<8x128xf32>
    %277 = arith.negf %276 : vector<8x128xf32>
    %278 = math.exp %277 : vector<8x128xf32>
    %cst_68 = arith.constant 1.000000e+00 : f32
    %279 = vector.broadcast %cst_68 : f32 to vector<8x128xf32>
    %280 = arith.addf %279, %278 : vector<8x128xf32>
    %281 = arith.divf %279, %280 : vector<8x128xf32>
    %cst_69 = arith.constant 2.000000e+00 : f32
    %282 = vector.broadcast %cst_69 : f32 to vector<8x128xf32>
    %283 = arith.mulf %282, %281 : vector<8x128xf32>
    %cst_70 = arith.constant 1.000000e+00 : f32
    %284 = vector.broadcast %cst_70 : f32 to vector<8x128xf32>
    %285 = arith.subf %283, %284 : vector<8x128xf32>
    %286 = arith.select %15, %285, %281 : vector<8x128xi1>, vector<8x128xf32>
    %287 = vector.extract_strided_slice %286 {offsets = [0, 0], sizes = [8, 32], strides = [1, 1]} : vector<8x128xf32> to vector<8x32xf32>
    %288 = vector.extract_strided_slice %286 {offsets = [0, 32], sizes = [8, 32], strides = [1, 1]} : vector<8x128xf32> to vector<8x32xf32>
    %289 = vector.extract_strided_slice %286 {offsets = [0, 64], sizes = [8, 32], strides = [1, 1]} : vector<8x128xf32> to vector<8x32xf32>
    %290 = vector.extract_strided_slice %286 {offsets = [0, 96], sizes = [8, 32], strides = [1, 1]} : vector<8x128xf32> to vector<8x32xf32>
    %291 = arith.mulf %288, %247 : vector<8x32xf32>
    %292 = arith.mulf %287, %289 : vector<8x32xf32>
    %293 = arith.addf %291, %292 : vector<8x32xf32>
    %294 = math.tanh %293 : vector<8x32xf32>
    %295 = arith.mulf %290, %294 : vector<8x32xf32>
    %296 = vector.extract_strided_slice %9 {offsets = [48, 0], sizes = [8, 128], strides = [1, 1]} : vector<64x128xf32> to vector<8x128xf32>
    %cst_71 = arith.constant dense<0.000000e+00> : vector<8x128xf32>
    %297 = tpu.matmul %271, %0, %cst_71 {dimension_numbers = #tpu.dot_dimension_numbers<[1], [0], [0], [1], [0, 0, 1, 1], [], []>} : vector<8x32xf32>, vector<32x128xf32>, vector<8x128xf32> -> vector<8x128xf32>
    %298 = arith.addf %296, %297 : vector<8x128xf32>
    %299 = arith.negf %298 : vector<8x128xf32>
    %300 = math.exp %299 : vector<8x128xf32>
    %cst_72 = arith.constant 1.000000e+00 : f32
    %301 = vector.broadcast %cst_72 : f32 to vector<8x128xf32>
    %302 = arith.addf %301, %300 : vector<8x128xf32>
    %303 = arith.divf %301, %302 : vector<8x128xf32>
    %cst_73 = arith.constant 2.000000e+00 : f32
    %304 = vector.broadcast %cst_73 : f32 to vector<8x128xf32>
    %305 = arith.mulf %304, %303 : vector<8x128xf32>
    %cst_74 = arith.constant 1.000000e+00 : f32
    %306 = vector.broadcast %cst_74 : f32 to vector<8x128xf32>
    %307 = arith.subf %305, %306 : vector<8x128xf32>
    %308 = arith.select %15, %307, %303 : vector<8x128xi1>, vector<8x128xf32>
    %309 = vector.extract_strided_slice %308 {offsets = [0, 0], sizes = [8, 32], strides = [1, 1]} : vector<8x128xf32> to vector<8x32xf32>
    %310 = vector.extract_strided_slice %308 {offsets = [0, 32], sizes = [8, 32], strides = [1, 1]} : vector<8x128xf32> to vector<8x32xf32>
    %311 = vector.extract_strided_slice %308 {offsets = [0, 64], sizes = [8, 32], strides = [1, 1]} : vector<8x128xf32> to vector<8x32xf32>
    %312 = vector.extract_strided_slice %308 {offsets = [0, 96], sizes = [8, 32], strides = [1, 1]} : vector<8x128xf32> to vector<8x32xf32>
    %313 = arith.mulf %310, %269 : vector<8x32xf32>
    %314 = arith.mulf %309, %311 : vector<8x32xf32>
    %315 = arith.addf %313, %314 : vector<8x32xf32>
    %316 = math.tanh %315 : vector<8x32xf32>
    %317 = arith.mulf %312, %316 : vector<8x32xf32>
    %cst_75 = arith.constant dense<0.000000e+00> : vector<8x128xf32>
    %318 = tpu.matmul %317, %4, %cst_75 {dimension_numbers = #tpu.dot_dimension_numbers<[1], [0], [0], [1], [0, 0, 1, 1], [], []>} : vector<8x32xf32>, vector<32x128xf32>, vector<8x128xf32> -> vector<8x128xf32>
    %319 = vector.broadcast %3 : vector<1x128xf32> to vector<8x128xf32>
    %320 = arith.addf %318, %319 : vector<8x128xf32>
    %cst_76 = arith.constant dense<0.000000e+00> : vector<8x128xf32>
    %321 = tpu.matmul %295, %2, %cst_76 {dimension_numbers = #tpu.dot_dimension_numbers<[1], [0], [0], [1], [0, 0, 1, 1], [], []>} : vector<8x32xf32>, vector<32x128xf32>, vector<8x128xf32> -> vector<8x128xf32>
    %322 = arith.addf %320, %321 : vector<8x128xf32>
    %323 = arith.negf %322 : vector<8x128xf32>
    %324 = math.exp %323 : vector<8x128xf32>
    %cst_77 = arith.constant 1.000000e+00 : f32
    %325 = vector.broadcast %cst_77 : f32 to vector<8x128xf32>
    %326 = arith.addf %325, %324 : vector<8x128xf32>
    %327 = arith.divf %325, %326 : vector<8x128xf32>
    %cst_78 = arith.constant 2.000000e+00 : f32
    %328 = vector.broadcast %cst_78 : f32 to vector<8x128xf32>
    %329 = arith.mulf %328, %327 : vector<8x128xf32>
    %cst_79 = arith.constant 1.000000e+00 : f32
    %330 = vector.broadcast %cst_79 : f32 to vector<8x128xf32>
    %331 = arith.subf %329, %330 : vector<8x128xf32>
    %332 = arith.select %15, %331, %327 : vector<8x128xi1>, vector<8x128xf32>
    %333 = vector.extract_strided_slice %332 {offsets = [0, 0], sizes = [8, 32], strides = [1, 1]} : vector<8x128xf32> to vector<8x32xf32>
    %334 = vector.extract_strided_slice %332 {offsets = [0, 32], sizes = [8, 32], strides = [1, 1]} : vector<8x128xf32> to vector<8x32xf32>
    %335 = vector.extract_strided_slice %332 {offsets = [0, 64], sizes = [8, 32], strides = [1, 1]} : vector<8x128xf32> to vector<8x32xf32>
    %336 = vector.extract_strided_slice %332 {offsets = [0, 96], sizes = [8, 32], strides = [1, 1]} : vector<8x128xf32> to vector<8x32xf32>
    %337 = arith.mulf %334, %293 : vector<8x32xf32>
    %338 = arith.mulf %333, %335 : vector<8x32xf32>
    %339 = arith.addf %337, %338 : vector<8x32xf32>
    %340 = math.tanh %339 : vector<8x32xf32>
    %341 = arith.mulf %336, %340 : vector<8x32xf32>
    %342 = vector.extract_strided_slice %9 {offsets = [56, 0], sizes = [8, 128], strides = [1, 1]} : vector<64x128xf32> to vector<8x128xf32>
    %cst_80 = arith.constant dense<0.000000e+00> : vector<8x128xf32>
    %343 = tpu.matmul %317, %0, %cst_80 {dimension_numbers = #tpu.dot_dimension_numbers<[1], [0], [0], [1], [0, 0, 1, 1], [], []>} : vector<8x32xf32>, vector<32x128xf32>, vector<8x128xf32> -> vector<8x128xf32>
    %344 = arith.addf %342, %343 : vector<8x128xf32>
    %345 = arith.negf %344 : vector<8x128xf32>
    %346 = math.exp %345 : vector<8x128xf32>
    %cst_81 = arith.constant 1.000000e+00 : f32
    %347 = vector.broadcast %cst_81 : f32 to vector<8x128xf32>
    %348 = arith.addf %347, %346 : vector<8x128xf32>
    %349 = arith.divf %347, %348 : vector<8x128xf32>
    %cst_82 = arith.constant 2.000000e+00 : f32
    %350 = vector.broadcast %cst_82 : f32 to vector<8x128xf32>
    %351 = arith.mulf %350, %349 : vector<8x128xf32>
    %cst_83 = arith.constant 1.000000e+00 : f32
    %352 = vector.broadcast %cst_83 : f32 to vector<8x128xf32>
    %353 = arith.subf %351, %352 : vector<8x128xf32>
    %354 = arith.select %15, %353, %349 : vector<8x128xi1>, vector<8x128xf32>
    %355 = vector.extract_strided_slice %354 {offsets = [0, 0], sizes = [8, 32], strides = [1, 1]} : vector<8x128xf32> to vector<8x32xf32>
    %356 = vector.extract_strided_slice %354 {offsets = [0, 32], sizes = [8, 32], strides = [1, 1]} : vector<8x128xf32> to vector<8x32xf32>
    %357 = vector.extract_strided_slice %354 {offsets = [0, 64], sizes = [8, 32], strides = [1, 1]} : vector<8x128xf32> to vector<8x32xf32>
    %358 = vector.extract_strided_slice %354 {offsets = [0, 96], sizes = [8, 32], strides = [1, 1]} : vector<8x128xf32> to vector<8x32xf32>
    %359 = arith.mulf %356, %315 : vector<8x32xf32>
    %360 = arith.mulf %355, %357 : vector<8x32xf32>
    %361 = arith.addf %359, %360 : vector<8x32xf32>
    %362 = math.tanh %361 : vector<8x32xf32>
    %363 = arith.mulf %358, %362 : vector<8x32xf32>
    %cst_84 = arith.constant dense<0.000000e+00> : vector<8x128xf32>
    %364 = tpu.matmul %363, %4, %cst_84 {dimension_numbers = #tpu.dot_dimension_numbers<[1], [0], [0], [1], [0, 0, 1, 1], [], []>} : vector<8x32xf32>, vector<32x128xf32>, vector<8x128xf32> -> vector<8x128xf32>
    %365 = vector.broadcast %3 : vector<1x128xf32> to vector<8x128xf32>
    %366 = arith.addf %364, %365 : vector<8x128xf32>
    %cst_85 = arith.constant dense<0.000000e+00> : vector<8x128xf32>
    %367 = tpu.matmul %341, %2, %cst_85 {dimension_numbers = #tpu.dot_dimension_numbers<[1], [0], [0], [1], [0, 0, 1, 1], [], []>} : vector<8x32xf32>, vector<32x128xf32>, vector<8x128xf32> -> vector<8x128xf32>
    %368 = arith.addf %366, %367 : vector<8x128xf32>
    %369 = arith.negf %368 : vector<8x128xf32>
    %370 = math.exp %369 : vector<8x128xf32>
    %cst_86 = arith.constant 1.000000e+00 : f32
    %371 = vector.broadcast %cst_86 : f32 to vector<8x128xf32>
    %372 = arith.addf %371, %370 : vector<8x128xf32>
    %373 = arith.divf %371, %372 : vector<8x128xf32>
    %cst_87 = arith.constant 2.000000e+00 : f32
    %374 = vector.broadcast %cst_87 : f32 to vector<8x128xf32>
    %375 = arith.mulf %374, %373 : vector<8x128xf32>
    %cst_88 = arith.constant 1.000000e+00 : f32
    %376 = vector.broadcast %cst_88 : f32 to vector<8x128xf32>
    %377 = arith.subf %375, %376 : vector<8x128xf32>
    %378 = arith.select %15, %377, %373 : vector<8x128xi1>, vector<8x128xf32>
    %379 = vector.extract_strided_slice %378 {offsets = [0, 0], sizes = [8, 32], strides = [1, 1]} : vector<8x128xf32> to vector<8x32xf32>
    %380 = vector.extract_strided_slice %378 {offsets = [0, 32], sizes = [8, 32], strides = [1, 1]} : vector<8x128xf32> to vector<8x32xf32>
    %381 = vector.extract_strided_slice %378 {offsets = [0, 64], sizes = [8, 32], strides = [1, 1]} : vector<8x128xf32> to vector<8x32xf32>
    %382 = vector.extract_strided_slice %378 {offsets = [0, 96], sizes = [8, 32], strides = [1, 1]} : vector<8x128xf32> to vector<8x32xf32>
    %383 = arith.mulf %380, %339 : vector<8x32xf32>
    %384 = arith.mulf %379, %381 : vector<8x32xf32>
    %385 = arith.addf %383, %384 : vector<8x32xf32>
    %386 = math.tanh %385 : vector<8x32xf32>
    %387 = arith.mulf %382, %386 : vector<8x32xf32>
    %c0_89 = arith.constant 0 : index
    %c0_90 = arith.constant 0 : index
    %388 = vector.load %arg8[%c0_89, %c0_90] : memref<32x128xf32, #tpu.memory_space<vmem>>, vector<32x128xf32>
    %cst_91 = arith.constant dense<0.000000e+00> : vector<8x128xf32>
    %389 = tpu.matmul %387, %388, %cst_91 {dimension_numbers = #tpu.dot_dimension_numbers<[1], [0], [0], [1], [0, 0, 1, 1], [], []>} : vector<8x32xf32>, vector<32x128xf32>, vector<8x128xf32> -> vector<8x128xf32>
    %c0_92 = arith.constant 0 : index
    %c0_93 = arith.constant 0 : index
    %390 = vector.load %arg9[%c0_92, %c0_93] : memref<1x128xf32, #tpu.memory_space<vmem>>, vector<1x128xf32>
    %391 = vector.broadcast %390 : vector<1x128xf32> to vector<8x128xf32>
    %392 = arith.addf %389, %391 : vector<8x128xf32>
    %393 = math.tanh %392 : vector<8x128xf32>
    %c0_94 = arith.constant 0 : index
    %c0_95 = arith.constant 0 : index
    %394 = vector.load %arg10[%c0_94, %c0_95] : memref<128x128xf32, #tpu.memory_space<vmem>>, vector<128x128xf32>
    %cst_96 = arith.constant dense<0.000000e+00> : vector<8x128xf32>
    %395 = tpu.matmul %393, %394, %cst_96 {dimension_numbers = #tpu.dot_dimension_numbers<[1], [0], [0], [1], [0, 0, 1, 1], [], []>} : vector<8x128xf32>, vector<128x128xf32>, vector<8x128xf32> -> vector<8x128xf32>
    %c0_97 = arith.constant 0 : index
    %c0_98 = arith.constant 0 : index
    %396 = vector.load %arg11[%c0_97, %c0_98] : memref<1x128xf32, #tpu.memory_space<vmem>>, vector<1x128xf32>
    %397 = vector.broadcast %396 : vector<1x128xf32> to vector<8x128xf32>
    %398 = arith.addf %395, %397 : vector<8x128xf32>
    %399 = arith.negf %398 : vector<8x128xf32>
    %400 = math.exp %399 : vector<8x128xf32>
    %cst_99 = arith.constant 1.000000e+00 : f32
    %401 = vector.broadcast %cst_99 : f32 to vector<8x128xf32>
    %402 = arith.addf %401, %400 : vector<8x128xf32>
    %403 = arith.divf %401, %402 : vector<8x128xf32>
    %c0_100 = arith.constant 0 : index
    %c0_101 = arith.constant 0 : index
    %404 = vector.load %arg12[%c0_100, %c0_101] : memref<128x128xf32, #tpu.memory_space<vmem>>, vector<128x128xf32>
    %cst_102 = arith.constant dense<0.000000e+00> : vector<8x128xf32>
    %405 = tpu.matmul %403, %404, %cst_102 {dimension_numbers = #tpu.dot_dimension_numbers<[1], [0], [0], [1], [0, 0, 1, 1], [], []>} : vector<8x128xf32>, vector<128x128xf32>, vector<8x128xf32> -> vector<8x128xf32>
    %c0_103 = arith.constant 0 : index
    %c0_104 = arith.constant 0 : index
    %406 = vector.load %arg13[%c0_103, %c0_104] : memref<1x128xf32, #tpu.memory_space<vmem>>, vector<1x128xf32>
    %407 = vector.broadcast %406 : vector<1x128xf32> to vector<8x128xf32>
    %408 = arith.addf %405, %407 : vector<8x128xf32>
    %c0_105 = arith.constant 0 : index
    %c0_106 = arith.constant 0 : index
    %409 = vector.load %arg14[%c0_105, %c0_106] : memref<8x128xf32, #tpu.memory_space<vmem>>, vector<8x128xf32>
    tpu.vector_store %arg14[%c0_105, %c0_106], %408 {strides = array<i32>} : memref<8x128xf32, #tpu.memory_space<vmem>>, vector<8x128xf32>,
    return
  }
  func.func @transform_0(%arg0: i32) -> (i32, i32) {
    %c0_i32 = arith.constant 0 : i32
    %c0_i32_0 = arith.constant 0 : i32
    %c0_i32_1 = arith.constant 0 : i32
    return %c0_i32, %c0_i32_0 : i32, i32
  }
  func.func @transform_1(%arg0: i32) -> (i32, i32) {
    %c0_i32 = arith.constant 0 : i32
    %c0_i32_0 = arith.constant 0 : i32
    %c0_i32_1 = arith.constant 0 : i32
    return %c0_i32, %c0_i32_0 : i32, i32
  }
  func.func @transform_2(%arg0: i32) -> (i32, i32) {
    %c0_i32 = arith.constant 0 : i32
    %c0_i32_0 = arith.constant 0 : i32
    %c0_i32_1 = arith.constant 0 : i32
    return %c0_i32, %c0_i32_0 : i32, i32
  }
  func.func @transform_3(%arg0: i32) -> (i32, i32) {
    %c0_i32 = arith.constant 0 : i32
    %c0_i32_0 = arith.constant 0 : i32
    %c0_i32_1 = arith.constant 0 : i32
    return %c0_i32, %c0_i32_0 : i32, i32
  }
  func.func @transform_4(%arg0: i32) -> (i32, i32) {
    %c0_i32 = arith.constant 0 : i32
    %c0_i32_0 = arith.constant 0 : i32
    %c0_i32_1 = arith.constant 0 : i32
    return %c0_i32, %c0_i32_0 : i32, i32
  }
  func.func @transform_5(%arg0: i32) -> (i32, i32) {
    %c0_i32 = arith.constant 0 : i32
    %c0_i32_0 = arith.constant 0 : i32
    %c0_i32_1 = arith.constant 0 : i32
    return %c0_i32, %c0_i32_0 : i32, i32
  }
  func.func @transform_6(%arg0: i32) -> (i32, i32) {
    %c0_i32 = arith.constant 0 : i32
    %c0_i32_0 = arith.constant 0 : i32
    %c0_i32_1 = arith.constant 0 : i32
    return %c0_i32, %c0_i32_0 : i32, i32
  }
  func.func @transform_7(%arg0: i32) -> (i32, i32) {
    %c0_i32 = arith.constant 0 : i32
    %c0_i32_0 = arith.constant 0 : i32
    %c0_i32_1 = arith.constant 0 : i32
    return %c0_i32, %c0_i32_0 : i32, i32
  }
  func.func @transform_8(%arg0: i32) -> (i32, i32) {
    %c0_i32 = arith.constant 0 : i32
    %c0_i32_0 = arith.constant 0 : i32
    %c0_i32_1 = arith.constant 0 : i32
    return %c0_i32, %c0_i32_0 : i32, i32
  }
  func.func @transform_9(%arg0: i32) -> (i32, i32) {
    %c0_i32 = arith.constant 0 : i32
    %c0_i32_0 = arith.constant 0 : i32
    %c0_i32_1 = arith.constant 0 : i32
    return %c0_i32, %c0_i32_0 : i32, i32
  }
  func.func @transform_10(%arg0: i32) -> (i32, i32) {
    %c0_i32 = arith.constant 0 : i32
    %c0_i32_0 = arith.constant 0 : i32
    %c0_i32_1 = arith.constant 0 : i32
    return %c0_i32, %c0_i32_0 : i32, i32
  }
  func.func @transform_11(%arg0: i32) -> (i32, i32) {
    %c0_i32 = arith.constant 0 : i32
    %c0_i32_0 = arith.constant 0 : i32
    %c0_i32_1 = arith.constant 0 : i32
    return %c0_i32, %c0_i32_0 : i32, i32
  }
  func.func @transform_12(%arg0: i32) -> (i32, i32) {
    %c0_i32 = arith.constant 0 : i32
    %c0_i32_0 = arith.constant 0 : i32
    %c0_i32_1 = arith.constant 0 : i32
    return %c0_i32, %c0_i32_0 : i32, i32
  }
  func.func @transform_13(%arg0: i32) -> (i32, i32) {
    %c0_i32 = arith.constant 0 : i32
    %c0_i32_0 = arith.constant 0 : i32
    %c0_i32_1 = arith.constant 0 : i32
    return %c0_i32, %c0_i32_0 : i32, i32
  }
}

</mosaic_0001>

<bundles_post_ra>
// kernel: lstm_model_forward.1
= control target key start
LH: loop header
LB: loop body
LE: loop exit
PB: predicated region body
PF: predicated region fallthrough
CT: control target
= control target key end

     0   :  { %18 = vsyncpa [#allocation3], 0  ;;  %s4267_s0 = inlined_call_operand.vmem [shape: f32[64,16], index: 0, kind: input, shape index: {}]   ;;  %s4268_s1 = inlined_call_operand.vmem [shape: f32[16,128], index: 1, kind: input, shape index: {}]   ;;  %s4269_s2 = inlined_call_operand.vmem [shape: f32[32,128], index: 2, kind: input, shape index: {}]   ;;  %s4270_s3 = inlined_call_operand.vmem [shape: f32[1,128], index: 3, kind: input, shape index: {}]   ;;  %s4271_s4 = inlined_call_operand.vmem [shape: f32[32,128], index: 4, kind: input, shape index: {}]   ;;  %s4272_s5 = inlined_call_operand.vmem [shape: f32[32,128], index: 5, kind: input, shape index: {}]   ;;  %s4273_s6 = inlined_call_operand.vmem [shape: f32[1,128], index: 6, kind: input, shape index: {}]   ;;  %s4274_s7 = inlined_call_operand.hbm [shape: f32[32,128], index: 7, kind: input, shape index: {}]   ;;  %s4275_s8 = inlined_call_operand.vmem [shape: f32[1,128], index: 8, kind: input, shape index: {}]   ;;  %s4276_s9 = inlined_call_operand.hbm [shape: f32[128,128], index: 9, kind: input, shape index: {}]   ;;  %s4277_s10 = inlined_call_operand.vmem [shape: f32[1,128], index: 10, kind: input, shape index: {}]   ;;  %s4278_s11 = inlined_call_operand.hbm [shape: f32[128,128], index: 11, kind: input, shape index: {}]   ;;  %s4279_s12 = inlined_call_operand.vmem [shape: f32[1,128], index: 12, kind: input, shape index: {}]   ;;  %s4280_s13 = inlined_call_operand.vmem [shape: f32[8,128], index: 13, kind: output, shape index: {}]  }
   0x1   :  { %19 = vsyncpa [#allocation5], 0  ;;  %s3521_s25 = smov [#allocation4]   ;;  %s3522_s27 = smov [#allocation2]  }
   0x2   :  { %s53_s26 = sshll.u32 %s3521_s25, 4  ;;  %s39_s28 = sshll.u32 %s3522_s27, 4  ;;  %s54_s26 = int_to_ptr.vmem [resolvable:$true] %s53_s26  ;;  %s40_s28 = int_to_ptr.vmem [resolvable:$true] %s39_s28 }
   0x3   :  { %s3465_s29 = scalar_lea.vmem %s54_s26, 2048  ;;  %p3470_p1 = scmp.lt.s32.totalorder %s54_s26, %s54_s26 }
   0x4   :  { %p3466_p0 = scmp.ne.s32.totalorder %s54_s26, %s3465_s29  ;;  %p3471_p2 = scmp.lt.s32.totalorder %s3465_s29, %s3465_s29 }
   0x6   :  { %p3472_p3 = por %p3471_p2, %p3470_p1 }
   0x8   :  { %p3473_p4 = pnand %p3472_p3, %p3466_p0 }
   0xa   :  { %3476 = shalt.err (!%p3473_p4)
}
   0xb   :  { %s3523_s30 = smov 128   ;;  %s3524_s14 = smov 8  }
   0xc   :  { %59 = dma.hbm_to_vmem [thread:$0]  %s4276_s9, 2048, %s54_s26, [#allocation5], %s3523_s30, %s3523_s30, %s3524_s14  }
   0xd   :  { %s3485_s17 = scalar_lea.vmem %s40_s28, 512  ;;  %p3490_p6 = scmp.lt.s32.totalorder %s40_s28, %s40_s28 }
   0xe   :  { %p3486_p5 = scmp.ne.s32.totalorder %s40_s28, %s3485_s17  ;;  %p3491_p7 = scmp.lt.s32.totalorder %s3485_s17, %s3485_s17 }
  0x10   :  { %p3492_p8 = por %p3491_p7, %p3490_p6 }
  0x12   :  { %p3493_p9 = pnand %p3492_p8, %p3486_p5 }
  0x14   :  { %3496 = shalt.err (!%p3493_p9)
}
  0x15   :  { %45 = dma.hbm_to_vmem [thread:$0]  %s4274_s7, 512, %s40_s28, [#allocation3], %s3523_s30, %s3523_s30, %s3524_s14  }
  0x16   :  { %s3525_s20 = smov [#allocation6]  }
  0x17   :  { %s67_s21 = sshll.u32 %s3525_s20, 4  ;;  %s68_s21 = int_to_ptr.vmem [resolvable:$true] %s67_s21 }
  0x18   :  { %s3505_s22 = scalar_lea.vmem %s68_s21, 2048  ;;  %p3510_p11 = scmp.lt.s32.totalorder %s68_s21, %s68_s21 }
  0x19   :  { %p3506_p10 = scmp.ne.s32.totalorder %s68_s21, %s3505_s22  ;;  %p3511_p12 = scmp.lt.s32.totalorder %s3505_s22, %s3505_s22 }
  0x1b   :  { %p3512_p13 = por %p3511_p12, %p3510_p11 }
  0x1d   :  { %p3513_p0 = pnand %p3512_p13, %p3506_p10 }
  0x1f   :  { %3516 = shalt.err (!%p3513_p0)
}
  0x20   :  { %73 = dma.hbm_to_vmem [thread:$0]  %s4278_s11, 2048, %s68_s21, [#allocation5], %s3523_s30, %s3523_s30, %s3524_s14  }
  0x21   :  { %3517 = dma.done.wait [#allocation3], 512  }
  0x22   :  { %3518 = vsyncadd [#allocation3], 4294966784 }
  0x23   :  { %3519 = dma.done.wait [#allocation5], 4096  }
  0x24   :  { %3520 = vsyncadd [#allocation5], 4294963200  ;;  %v3526_v0 = vmov 0.0   ;;  %vm3527_vm0 = vmmov 0   ;;  %v108_v1 = vld [vmem:[%s4268_s1 + $0x8] sm:$0xff]  ;;  %v3618_v2 = vld [vmem:[%s4269_s2 + $0x18] sm:$0xff]  ;;  %v245_v19 = vlaneseq }
  0x25   :  { %2987 = vmatprep.subr.mxu1 %v3526_v0  ;;  %2995 = vmatprep.mubr.msk.f32.mxu1 %vm3527_vm0, %v3526_v0  ;;  %v107_v3 = vld [vmem:[%s4268_s1] sm:$0xff]  ;;  %v3627_v4 = vld [vmem:[%s4269_s2 + $0x10] sm:$0xff]  ;;  %vm115_vm1 = vcmask 130048   ;;  %v100_v6 = vld [vmem:[%s4267_s0 + $0x8] sm:$0xff]  ;;  %s3528_s22 = smov 64   ;;  %s3529_s9 = smov 32  }
  0x26   :  { %2971 = vmatprep.subr.mxu0 %v108_v1  ;;  %2988 = vmatpush3.msra.mxu1 %v3618_v2  ;;  %v99_v5 = vld [vmem:[%s4267_s0] sm:$0xff]  ;;  %v3640_v7 = vld [vmem:[%s4269_s2 + $0x8] sm:$0xff]  ;;  %v246_v20 = vand.u32 127, %v245_v19  ;;  %v101_v31 = vld [vmem:[%s4267_s0 + $0x10] sm:$0xff]  ;;  %vm250_vm5 = vcmask 261120  }
  0x27   :  { %2972 = vmatpush3.msra.mxu0 %v108_v1  ;;  %2989 = vmatprep.subr.mxu1 %v3526_v0  ;;  %v3648_v8 = vld [vmem:[%s4269_s2] sm:$0xff]  ;;  %v102_v32 = vld [vmem:[%s4267_s0 + $0x18] sm:$0xff]  ;;  %v3696_v35 = vld [vmem:[%s4271_s4 + $0x10] sm:$0xff] }
  0x28   :  { %2973 = vmatprep.subr.mxu0 %v107_v3  ;;  %2990 = vmatpush3.msra.mxu1 %v3627_v4  ;;  %v3663_v10 = vld [vmem:[%s4270_s3] ss:$0 sm:$0xff]  ;;  %vm247_vm2 = vcmp.ge.s32.totalorder %v246_v20, 64  ;;  %vm248_vm3 = vcmp.lt.s32.totalorder %v246_v20, 96  ;;  %v3686_v33 = vld [vmem:[%s4271_s4 + $0x18] sm:$0xff]  ;;  %v3708_v37 = vld [vmem:[%s4271_s4 + $0x8] sm:$0xff] }
  0x29   :  { %2974 = vmatpush3.msra.mxu0 %v107_v3  ;;  %2975 = vmatprep.mubr.msk.f32.mxu0 %vm115_vm1, %v99_v5  ;;  %vm3666_vm4 = vmand %vm247_vm2, %vm248_vm3  ;;  %v103_v34 = vld [vmem:[%s4267_s0 + $0x20] sm:$0xff]  ;;  %v3703_v36 = vld [vmem:[%s4272_s5 + $0x18] sm:$0xff] }
  0x2a   :  { %2991 = vmatprep.subr.mxu1 %v3526_v0  ;;  %2976 = vmatmul.mubr.msk.f32.vlgmr.msra.gmra.mxu0 %vm115_vm1, %v100_v6  ;;  %v104_v38 = vld [vmem:[%s4267_s0 + $0x28] sm:$0xff]  ;;  %v105_v39 = vld [vmem:[%s4267_s0 + $0x30] sm:$0xff]  ;;  %v3730_v41 = vld [vmem:[%s4271_s4] sm:$0xff] }
  0x2b   :  { %2992 = vmatpush3.msra.mxu1 %v3640_v7  ;;  %3009 = vmatprep.subr.mxu0 %v3526_v0  ;;  %v3723_v40 = vld [vmem:[%s4272_s5 + $0x10] sm:$0xff]  ;;  %v3737_v42 = vld [vmem:[%s4272_s5 + $0x8] sm:$0xff]  ;;  %v106_v43 = vld [vmem:[%s4267_s0 + $0x38] sm:$0xff] }
  0x2c   :  { %2993 = vmatprep.subr.mxu1 %v3526_v0  ;;  %2978 = vmatprep.mubr.msk.f32.mxu0 %vm115_vm1, %v101_v31  ;;  %v3756_v45 = vld [vmem:[%s4272_s5] sm:$0xff] }
  0x2d   :  { %2994 = vmatpush3.msra.mxu1 %v3648_v8  ;;  %3010 = vmatpush3.msra.mxu0 %v3703_v36  ;;  %v3809_v57 = vld [vmem:[%s4273_s6] ss:$0 sm:$0xff] }
  0x2e   :  { %2996 = vmatmul.mubr.f32.vlgmr.msra.gmra.mxu1 %v3526_v0  ;;  %2998 = vmatprep.subr.mxu1 %v3526_v0  ;;  %v2447_v23 = vld [vmem:[#allocation2] sm:$0xff] }
  0x2f   :  { %3006 = vmatprep.mubr.msk.f32.mxu1 %vm3527_vm0, %v3526_v0  ;;  %2999 = vmatpush3.msra.mxu1 %v3686_v33 }
  0x30   :  { %2979 = vmatmul.mubr.msk.f32.gmra.mxu0 %vm115_vm1, %v102_v32  ;;  %3000 = vmatprep.subr.mxu1 %v3526_v0 }
  0x31   :  { %2981 = vmatprep.mubr.msk.f32.mxu0 %vm115_vm1, %v103_v34  ;;  %3001 = vmatpush3.msra.mxu1 %v3696_v35 }
  0x32   :  { %3002 = vmatprep.subr.mxu1 %v3526_v0  ;;  %3011 = vmatprep.subr.mxu0 %v3526_v0 }
  0x33   :  { %3003 = vmatpush3.msra.mxu1 %v3708_v37  ;;  %3012 = vmatpush3.msra.mxu0 %v3723_v40 }
  0x34   :  { %2982 = vmatmul.mubr.msk.f32.gmra.mxu0 %vm115_vm1, %v104_v38  ;;  %3004 = vmatprep.subr.mxu1 %v3526_v0 }
  0x35   :  { %2984 = vmatprep.mubr.msk.f32.mxu0 %vm115_vm1, %v105_v39  ;;  %3005 = vmatpush3.msra.mxu1 %v3730_v41 }
  0x36   :  { %3013 = vmatprep.subr.mxu0 %v3526_v0  ;;  %3020 = vmatprep.subr.mxu1 %v3526_v0 }
  0x37   :  { %3014 = vmatpush3.msra.mxu0 %v3737_v42 }
  0x38   :  { %2985 = vmatmul.mubr.msk.f32.gmra.mxu0 %vm115_vm1, %v106_v43  ;;  %3015 = vmatprep.subr.mxu0 %v3526_v0 }
  0x39   :  { %3017 = vmatprep.mubr.msk.f32.mxu0 %vm3527_vm0, %v3526_v0  ;;  %3016 = vmatpush3.msra.mxu0 %v3756_v45 }
  0x3a   :  { %3031 = vmatprep.subr.mxu0 %v3526_v0 }
  0x3c   :  { %3018 = vmatmul.mubr.f32.vlgmr.msra.gmra.mxu0 %v3526_v0 }
  0x3d   :  { %3032 = vmatpush3.msra.mxu0 %v3686_v33  ;;  %3039 = vmatprep.mubr.msk.f32.mxu0 %vm3527_vm0, %v3526_v0 }
  0x3e   :  { %3033 = vmatprep.subr.mxu0 %v3526_v0 }
  0x3f   :  { %3034 = vmatpush3.msra.mxu0 %v3696_v35 }
  0x40   :  { %3035 = vmatprep.subr.mxu0 %v3526_v0 }
  0x41   :  { %3036 = vmatpush3.msra.mxu0 %v3708_v37 }
  0x42   :  { %3037 = vmatprep.subr.mxu0 %v3526_v0 }
  0x43   :  { %3038 = vmatpush3.msra.mxu0 %v3730_v41 }
  0x44   :  { %3053 = vmatprep.subr.mxu0 %v3526_v0 }
  0xea   :  { %v3658_v9 = vpop.f32.mrf.mxu0 }
  0xeb   :  { %v212_v63 = vadd.f32 %v3658_v9, %v3663_v10 }
  0xec   :  { %v206_v11 = vpop.f32.mrf.mxu0 }
  0xed   :  { %v207_v12 = vadd.f32 %v3663_v10, %v206_v11 }
  0xee   :  { %v320_v13 = vpop.f32.mrf.mxu1 }
  0xef   :  { %v324_v14 = vadd.f32 %v320_v13, %v207_v12 }
  0xf0   :  { %v2997_v15 = vpop.f32.mrf.mxu1  ;;  %v3794_v49 = vpop.f32.mrf.mxu0 }
  0xf1   :  { %v2742_v16 = vmul.f32 -1.442695, %v324_v14 }
  0xf2   :  { %v3796_v50 = vpop.f32.mrf.mxu0 }
  0xf3   :  { %3341 = vpow2.f32 %v2742_v16 }
  0xf4   :  { %v3798_v51 = vpop.f32.mrf.mxu0 }
  0xf6   :  { %v3800_v52 = vpop.f32.mrf.mxu0 }
  0xf8   :  { %v3802_v53 = vpop.f32.mrf.mxu0 }
  0xfa   :  { %v3804_v54 = vpop.f32.mrf.mxu0 }
  0xfc   :  { %v498_v55 = vpop.f32.mrf.mxu0 }
  0xfe   :  { %v3019_v56 = vpop.f32.mrf.mxu0 }
 0x100   :  { %v3342_v17 = vpop.eup %3341 }
 0x101   :  { %v328_v18 = vadd.f32 1.0, %v3342_v17 }
 0x103   :  { %3343 = vrcp.f32 %v328_v18 }
 0x110   :  { %v3344_v21 = vpop.eup %3343 }
 0x111   :  { %v331_v22 = vmul.f32 2.0, %v3344_v21 }
 0x113   :  { %v2743_v24 = vadd.f32 -1.0, %v331_v22 }
 0x115   :  { %v333_v25 = vsel %vm3666_vm4, %v2743_v24, %v3344_v21 }
 0x116   :  { %336 = vrot.lane.b32.xlu0 %v333_v25, %s3528_s22  ;;  %v334_v28 = vmul.f32 0.0, %v333_v25 }
 0x188   :  { %v337_v26 = vpop.permute.xlu0 %336 }
 0x189   :  { %v339_v27 = vmul.f32 %v337_v26, %v333_v25 }
 0x18b   :  { %341 = vrot.lane.b32.xlu0 %v339_v27, %s3529_s9 }
 0x1fd   :  { %v342_v29 = vpop.permute.xlu0 %341 }
 0x1fe   :  { %v3674_v30 = vadd.f32 %v342_v29, %v334_v28 }
 0x200   :  { %3345 = vtanh.f32 %v3674_v30 }
 0x20d   :  { %v3346_v44 = vpop.eup %3345 }
 0x20e   :  { %347 = vrot.lane.b32.xlu1 %v3346_v44, %s3528_s22 }
 0x280   :  { %v348_v46 = vpop.permute.xlu1 %347 }
 0x281   :  { %v350_v47 = vmul.f32 %v348_v46, %v333_v25 }
 0x283   :  { %358 = vrot.lane.b32.xlu1 %v350_v47, %s3529_s9 }
 0x2f5   :  { %v359_v48 = vpop.permute.xlu1 %358 }
 0x2f6   :  { %3007 = vmatmul.mubr.msk.f32.vlgmr.msra.gmra.mxu1 %vm250_vm5, %v359_v48 }
 0x2f7   :  { %3021 = vmatpush3.msra.mxu1 %v3618_v2  ;;  %3028 = vmatprep.mubr.msk.f32.mxu1 %vm3527_vm0, %v3526_v0 }
 0x2f8   :  { %3022 = vmatprep.subr.mxu1 %v3526_v0 }
 0x2f9   :  { %3023 = vmatpush3.msra.mxu1 %v3627_v4 }
 0x2fa   :  { %3024 = vmatprep.subr.mxu1 %v3526_v0 }
 0x2fb   :  { %3025 = vmatpush3.msra.mxu1 %v3640_v7 }
 0x2fc   :  { %3026 = vmatprep.subr.mxu1 %v3526_v0 }
 0x2fd   :  { %3027 = vmatpush3.msra.mxu1 %v3648_v8 }
 0x2fe   :  { %3029 = vmatmul.mubr.msk.f32.vlgmr.msra.gmra.mxu1 %vm250_vm5, %v359_v48  ;;  %3042 = vmatprep.subr.mxu1 %v3526_v0 }
 0x2ff   :  { %3043 = vmatpush3.msra.mxu1 %v3703_v36  ;;  %3050 = vmatprep.mubr.msk.f32.mxu1 %vm3527_vm0, %v3526_v0 }
 0x300   :  { %3044 = vmatprep.subr.mxu1 %v3526_v0 }
 0x301   :  { %3045 = vmatpush3.msra.mxu1 %v3723_v40 }
 0x302   :  { %3046 = vmatprep.subr.mxu1 %v3526_v0 }
 0x303   :  { %3047 = vmatpush3.msra.mxu1 %v3737_v42 }
 0x304   :  { %3048 = vmatprep.subr.mxu1 %v3526_v0 }
 0x305   :  { %3049 = vmatpush3.msra.mxu1 %v3756_v45 }
 0x306   :  { %3064 = vmatprep.subr.mxu1 %v3526_v0 }
 0x3b6   :  { %v428_v58 = vpop.f32.mrf.mxu1 }
 0x3b7   :  { %v429_v59 = vadd.f32 %v3809_v57, %v428_v58 }
 0x3b8   :  { %v3008_v60 = vpop.f32.mrf.mxu1 }
 0x3b9   :  { %v502_v61 = vadd.f32 %v498_v55, %v429_v59 }
 0x3bb   :  { %v2746_v62 = vmul.f32 -1.442695, %v502_v61 }
 0x3bd   :  { %3347 = vpow2.f32 %v2746_v62 }
 0x3be   :  { %v595_v1 = vpop.f32.mrf.mxu1 }
 0x3bf   :  { %v599_v3 = vadd.f32 %v595_v1, %v212_v63  ;;  %v217_v63 = vadd.f32 %v3663_v10, %v3796_v50 }
 0x3c0   :  { %v3030_v5 = vpop.f32.mrf.mxu1 }
 0x3c1   :  { %v2749_v6 = vmul.f32 -1.442695, %v599_v3 }
 0x3c3   :  { %3349 = vpow2.f32 %v2749_v6 }
 0x3ca   :  { %v3348_v11 = vpop.eup %3347 }
 0x3cb   :  { %v506_v12 = vadd.f32 1.0, %v3348_v11 }
 0x3cd   :  { %3351 = vrcp.f32 %v506_v12 }
 0x3d0   :  { %v3350_v13 = vpop.eup %3349 }
 0x3d1   :  { %v603_v14 = vadd.f32 1.0, %v3350_v13 }
 0x3d3   :  { %3353 = vrcp.f32 %v603_v14 }
 0x3da   :  { %v3352_v15 = vpop.eup %3351 }
 0x3db   :  { %v509_v16 = vmul.f32 2.0, %v3352_v15 }
 0x3dd   :  { %v2747_v17 = vadd.f32 -1.0, %v509_v16 }
 0x3df   :  { %v511_v18 = vsel %vm3666_vm4, %v2747_v17, %v3352_v15 }
 0x3e0   :  { %v3354_v19 = vpop.eup %3353  ;;  %514 = vrot.lane.b32.xlu1 %v511_v18, %s3528_s22  ;;  %v512_v27 = vmul.f32 0.0, %v511_v18 }
 0x3e1   :  { %v606_v9 = vmul.f32 2.0, %v3354_v19 }
 0x3e3   :  { %v2750_v20 = vadd.f32 -1.0, %v606_v9 }
 0x3e5   :  { %v608_v21 = vsel %vm3666_vm4, %v2750_v20, %v3354_v19 }
 0x3e6   :  { %611 = vrot.lane.b32.xlu0 %v608_v21, %s3528_s22  ;;  %v609_v31 = vmul.f32 %v608_v21, %v3674_v30 }
 0x452   :  { %v515_v22 = vpop.permute.xlu1 %514 }
 0x453   :  { %v517_v24 = vmul.f32 %v515_v22, %v511_v18 }
 0x455   :  { %519 = vrot.lane.b32.xlu1 %v517_v24, %s3529_s9 }
 0x458   :  { %v612_v25 = vpop.permute.xlu0 %611 }
 0x459   :  { %v614_v26 = vmul.f32 %v612_v25, %v608_v21 }
 0x45b   :  { %616 = vrot.lane.b32.xlu0 %v614_v26, %s3529_s9 }
 0x4c7   :  { %v520_v28 = vpop.permute.xlu1 %519 }
 0x4c8   :  { %v3822_v29 = vadd.f32 %v520_v28, %v512_v27 }
 0x4ca   :  { %3355 = vtanh.f32 %v3822_v29 }
 0x4cd   :  { %v617_v32 = vpop.permute.xlu0 %616 }
 0x4ce   :  { %v3826_v34 = vadd.f32 %v617_v32, %v609_v31 }
 0x4d0   :  { %3357 = vtanh.f32 %v3826_v34 }
 0x4d7   :  { %v3356_v38 = vpop.eup %3355 }
 0x4d8   :  { %525 = vrot.lane.b32.xlu1 %v3356_v38, %s3528_s22 }
 0x4dd   :  { %v3358_v39 = vpop.eup %3357 }
 0x4de   :  { %622 = vrot.lane.b32.xlu0 %v3358_v39, %s3528_s22 }
 0x54a   :  { %v526_v43 = vpop.permute.xlu1 %525 }
 0x54b   :  { %v528_v44 = vmul.f32 %v526_v43, %v511_v18 }
 0x54d   :  { %702 = vrot.lane.b32.xlu1 %v528_v44, %s3529_s9 }
 0x550   :  { %v623_v46 = vpop.permute.xlu0 %622 }
 0x551   :  { %v625_v47 = vmul.f32 %v623_v46, %v608_v21 }
 0x553   :  { %627 = vrot.lane.b32.xlu0 %v625_v47, %s3529_s9 }
 0x5bf   :  { %v703_v30 = vpop.permute.xlu1 %702 }
 0x5c0   :  { %3051 = vmatmul.mubr.msk.f32.vlgmr.msra.gmra.mxu1 %vm250_vm5, %v703_v30 }
 0x5c1   :  { %3065 = vmatpush3.msra.mxu1 %v3686_v33  ;;  %3072 = vmatprep.mubr.msk.f32.mxu1 %vm3527_vm0, %v3526_v0 }
 0x5c2   :  { %3066 = vmatprep.subr.mxu1 %v3526_v0 }
 0x5c3   :  { %3067 = vmatpush3.msra.mxu1 %v3696_v35 }
 0x5c4   :  { %3068 = vmatprep.subr.mxu1 %v3526_v0 }
 0x5c5   :  { %v628_v48 = vpop.permute.xlu0 %627  ;;  %3069 = vmatpush3.msra.mxu1 %v3708_v37 }
 0x5c6   :  { %3040 = vmatmul.mubr.msk.f32.vlgmr.msra.gmra.mxu0 %vm250_vm5, %v628_v48  ;;  %3070 = vmatprep.subr.mxu1 %v3526_v0 }
 0x5c7   :  { %3054 = vmatpush3.msra.mxu0 %v3618_v2  ;;  %3061 = vmatprep.mubr.msk.f32.mxu0 %vm3527_vm0, %v3526_v0 }
 0x5c8   :  { %3055 = vmatprep.subr.mxu0 %v3526_v0  ;;  %3071 = vmatpush3.msra.mxu1 %v3730_v41 }
 0x5c9   :  { %3056 = vmatpush3.msra.mxu0 %v3627_v4  ;;  %3086 = vmatprep.subr.mxu1 %v3526_v0 }
 0x5ca   :  { %3057 = vmatprep.subr.mxu0 %v3526_v0 }
 0x5cb   :  { %3058 = vmatpush3.msra.mxu0 %v3640_v7 }
 0x5cc   :  { %3059 = vmatprep.subr.mxu0 %v3526_v0 }
 0x5cd   :  { %3060 = vmatpush3.msra.mxu0 %v3648_v8 }
 0x5ce   :  { %3062 = vmatmul.mubr.msk.f32.vlgmr.msra.gmra.mxu0 %vm250_vm5, %v628_v48  ;;  %3075 = vmatprep.subr.mxu0 %v3526_v0 }
 0x5cf   :  { %3076 = vmatpush3.msra.mxu0 %v3703_v36  ;;  %3083 = vmatprep.mubr.msk.f32.mxu0 %vm3527_vm0, %v3526_v0 }
 0x5d0   :  { %3077 = vmatprep.subr.mxu0 %v3526_v0 }
 0x5d1   :  { %3078 = vmatpush3.msra.mxu0 %v3723_v40 }
 0x5d2   :  { %3079 = vmatprep.subr.mxu0 %v3526_v0 }
 0x5d3   :  { %3080 = vmatpush3.msra.mxu0 %v3737_v42 }
 0x5d4   :  { %3081 = vmatprep.subr.mxu0 %v3526_v0 }
 0x5d5   :  { %3082 = vmatpush3.msra.mxu0 %v3756_v45 }
 0x5d6   :  { %3097 = vmatprep.subr.mxu0 %v3526_v0 }
 0x680   :  { %v772_v55 = vpop.f32.mrf.mxu1 }
 0x682   :  { %v3052_v56 = vpop.f32.mrf.mxu1 }
 0x686   :  { %v697_v58 = vpop.f32.mrf.mxu0 }
 0x687   :  { %v698_v59 = vadd.f32 %v3809_v57, %v697_v58 }
 0x688   :  { %v3041_v60 = vpop.f32.mrf.mxu0 }
 0x689   :  { %v776_v61 = vadd.f32 %v772_v55, %v698_v59 }
 0x68b   :  { %v2753_v62 = vmul.f32 -1.442695, %v776_v61 }
 0x68d   :  { %3359 = vpow2.f32 %v2753_v62  ;;  %v222_v62 = vadd.f32 %v3794_v49, %v3663_v10 }
 0x68e   :  { %v869_v1 = vpop.f32.mrf.mxu0 }
 0x68f   :  { %v873_v3 = vadd.f32 %v869_v1, %v217_v63 }
 0x690   :  { %v3063_v5 = vpop.f32.mrf.mxu0 }
 0x691   :  { %v2756_v6 = vmul.f32 -1.442695, %v873_v3 }
 0x693   :  { %3361 = vpow2.f32 %v2756_v6 }
 0x69a   :  { %v3360_v11 = vpop.eup %3359 }
 0x69b   :  { %v780_v12 = vadd.f32 1.0, %v3360_v11 }
 0x69d   :  { %3363 = vrcp.f32 %v780_v12 }
 0x6a0   :  { %v3362_v13 = vpop.eup %3361 }
 0x6a1   :  { %v877_v14 = vadd.f32 1.0, %v3362_v13 }
 0x6a3   :  { %3365 = vrcp.f32 %v877_v14 }
 0x6aa   :  { %v3364_v15 = vpop.eup %3363 }
 0x6ab   :  { %v783_v16 = vmul.f32 2.0, %v3364_v15 }
 0x6ad   :  { %v2754_v17 = vadd.f32 -1.0, %v783_v16 }
 0x6af   :  { %v785_v18 = vsel %vm3666_vm4, %v2754_v17, %v3364_v15 }
 0x6b0   :  { %v3366_v19 = vpop.eup %3365  ;;  %788 = vrot.lane.b32.xlu1 %v785_v18, %s3528_s22  ;;  %v786_v26 = vmul.f32 %v785_v18, %v3822_v29 }
 0x6b1   :  { %v880_v50 = vmul.f32 2.0, %v3366_v19 }
 0x6b3   :  { %v2757_v9 = vadd.f32 -1.0, %v880_v50 }
 0x6b5   :  { %v882_v20 = vsel %vm3666_vm4, %v2757_v9, %v3366_v19 }
 0x6b6   :  { %885 = vrot.lane.b32.xlu0 %v882_v20, %s3528_s22  ;;  %v883_v31 = vmul.f32 %v882_v20, %v3826_v34 }
 0x722   :  { %v789_v21 = vpop.permute.xlu1 %788 }
 0x723   :  { %v791_v22 = vmul.f32 %v789_v21, %v785_v18 }
 0x725   :  { %793 = vrot.lane.b32.xlu1 %v791_v22, %s3529_s9 }
 0x728   :  { %v886_v24 = vpop.permute.xlu0 %885 }
 0x729   :  { %v888_v25 = vmul.f32 %v886_v24, %v882_v20 }
 0x72b   :  { %890 = vrot.lane.b32.xlu0 %v888_v25, %s3529_s9 }
 0x797   :  { %v794_v27 = vpop.permute.xlu1 %793 }
 0x798   :  { %v3878_v28 = vadd.f32 %v794_v27, %v786_v26 }
 0x79a   :  { %3367 = vtanh.f32 %v3878_v28 }
 0x79d   :  { %v891_v32 = vpop.permute.xlu0 %890 }
 0x79e   :  { %v3882_v38 = vadd.f32 %v891_v32, %v883_v31 }
 0x7a0   :  { %3369 = vtanh.f32 %v3882_v38 }
 0x7a7   :  { %v3368_v39 = vpop.eup %3367 }
 0x7a8   :  { %799 = vrot.lane.b32.xlu1 %v3368_v39, %s3528_s22 }
 0x7ad   :  { %v3370_v43 = vpop.eup %3369 }
 0x7ae   :  { %896 = vrot.lane.b32.xlu0 %v3370_v43, %s3528_s22 }
 0x81a   :  { %v800_v44 = vpop.permute.xlu1 %799 }
 0x81b   :  { %v802_v29 = vmul.f32 %v800_v44, %v785_v18 }
 0x81d   :  { %976 = vrot.lane.b32.xlu1 %v802_v29, %s3529_s9 }
 0x820   :  { %v897_v46 = vpop.permute.xlu0 %896 }
 0x821   :  { %v899_v47 = vmul.f32 %v897_v46, %v882_v20 }
 0x823   :  { %901 = vrot.lane.b32.xlu0 %v899_v47, %s3529_s9 }
 0x88f   :  { %v977_v34 = vpop.permute.xlu1 %976 }
 0x890   :  { %3084 = vmatmul.mubr.msk.f32.vlgmr.msra.gmra.mxu0 %vm250_vm5, %v977_v34 }
 0x891   :  { %3098 = vmatpush3.msra.mxu0 %v3686_v33  ;;  %3105 = vmatprep.mubr.msk.f32.mxu0 %vm3527_vm0, %v3526_v0 }
 0x892   :  { %3099 = vmatprep.subr.mxu0 %v3526_v0 }
 0x893   :  { %3100 = vmatpush3.msra.mxu0 %v3696_v35 }
 0x894   :  { %3101 = vmatprep.subr.mxu0 %v3526_v0 }
 0x895   :  { %v902_v30 = vpop.permute.xlu0 %901  ;;  %3102 = vmatpush3.msra.mxu0 %v3708_v37 }
 0x896   :  { %3073 = vmatmul.mubr.msk.f32.vlgmr.msra.gmra.mxu1 %vm250_vm5, %v902_v30  ;;  %3103 = vmatprep.subr.mxu0 %v3526_v0 }
 0x897   :  { %3087 = vmatpush3.msra.mxu1 %v3618_v2  ;;  %3094 = vmatprep.mubr.msk.f32.mxu1 %vm3527_vm0, %v3526_v0 }
 0x898   :  { %3088 = vmatprep.subr.mxu1 %v3526_v0  ;;  %3104 = vmatpush3.msra.mxu0 %v3730_v41 }
 0x899   :  { %3089 = vmatpush3.msra.mxu1 %v3627_v4  ;;  %3119 = vmatprep.subr.mxu0 %v3526_v0 }
 0x89a   :  { %3090 = vmatprep.subr.mxu1 %v3526_v0 }
 0x89b   :  { %3091 = vmatpush3.msra.mxu1 %v3640_v7 }
 0x89c   :  { %3092 = vmatprep.subr.mxu1 %v3526_v0 }
 0x89d   :  { %3093 = vmatpush3.msra.mxu1 %v3648_v8 }
 0x89e   :  { %3095 = vmatmul.mubr.msk.f32.vlgmr.msra.gmra.mxu1 %vm250_vm5, %v902_v30  ;;  %3108 = vmatprep.subr.mxu1 %v3526_v0 }
 0x89f   :  { %3109 = vmatpush3.msra.mxu1 %v3703_v36  ;;  %3116 = vmatprep.mubr.msk.f32.mxu1 %vm3527_vm0, %v3526_v0 }
 0x8a0   :  { %3110 = vmatprep.subr.mxu1 %v3526_v0 }
 0x8a1   :  { %3111 = vmatpush3.msra.mxu1 %v3723_v40 }
 0x8a2   :  { %3112 = vmatprep.subr.mxu1 %v3526_v0 }
 0x8a3   :  { %3113 = vmatpush3.msra.mxu1 %v3737_v42 }
 0x8a4   :  { %3114 = vmatprep.subr.mxu1 %v3526_v0 }
 0x8a5   :  { %3115 = vmatpush3.msra.mxu1 %v3756_v45 }
 0x8a6   :  { %3130 = vmatprep.subr.mxu1 %v3526_v0 }
 0x950   :  { %v1046_v48 = vpop.f32.mrf.mxu0 }
 0x952   :  { %v3085_v55 = vpop.f32.mrf.mxu0 }
 0x956   :  { %v971_v56 = vpop.f32.mrf.mxu1 }
 0x957   :  { %v972_v58 = vadd.f32 %v3809_v57, %v971_v56 }
 0x958   :  { %v3074_v59 = vpop.f32.mrf.mxu1 }
 0x959   :  { %v1050_v60 = vadd.f32 %v1046_v48, %v972_v58 }
 0x95b   :  { %v2760_v61 = vmul.f32 -1.442695, %v1050_v60  ;;  %v227_v60 = vadd.f32 %v3663_v10, %v3800_v52 }
 0x95d   :  { %3371 = vpow2.f32 %v2760_v61 }
 0x95e   :  { %v1143_v63 = vpop.f32.mrf.mxu1 }
 0x95f   :  { %v1147_v1 = vadd.f32 %v1143_v63, %v222_v62 }
 0x960   :  { %v3096_v3 = vpop.f32.mrf.mxu1 }
 0x961   :  { %v2763_v5 = vmul.f32 -1.442695, %v1147_v1 }
 0x963   :  { %3373 = vpow2.f32 %v2763_v5 }
 0x96a   :  { %v3372_v6 = vpop.eup %3371 }
 0x96b   :  { %v1054_v11 = vadd.f32 1.0, %v3372_v6 }
 0x96d   :  { %3375 = vrcp.f32 %v1054_v11 }
 0x970   :  { %v3374_v12 = vpop.eup %3373 }
 0x971   :  { %v1151_v13 = vadd.f32 1.0, %v3374_v12 }
 0x973   :  { %3377 = vrcp.f32 %v1151_v13 }
 0x97a   :  { %v3376_v14 = vpop.eup %3375 }
 0x97b   :  { %v1057_v15 = vmul.f32 2.0, %v3376_v14 }
 0x97d   :  { %v2761_v16 = vadd.f32 -1.0, %v1057_v15 }
 0x97f   :  { %v1059_v17 = vsel %vm3666_vm4, %v2761_v16, %v3376_v14 }
 0x980   :  { %v3378_v18 = vpop.eup %3377  ;;  %1062 = vrot.lane.b32.xlu1 %v1059_v17, %s3528_s22  ;;  %v1060_v24 = vmul.f32 %v1059_v17, %v3878_v28 }
 0x981   :  { %v1154_v49 = vmul.f32 2.0, %v3378_v18 }
 0x983   :  { %v2764_v19 = vadd.f32 -1.0, %v1154_v49 }
 0x985   :  { %v1156_v50 = vsel %vm3666_vm4, %v2764_v19, %v3378_v18 }
 0x986   :  { %1159 = vrot.lane.b32.xlu0 %v1156_v50, %s3528_s22  ;;  %v1157_v27 = vmul.f32 %v1156_v50, %v3882_v38 }
 0x9f2   :  { %v1063_v9 = vpop.permute.xlu1 %1062 }
 0x9f3   :  { %v1065_v20 = vmul.f32 %v1063_v9, %v1059_v17 }
 0x9f5   :  { %1067 = vrot.lane.b32.xlu1 %v1065_v20, %s3529_s9 }
 0x9f8   :  { %v1160_v21 = vpop.permute.xlu0 %1159 }
 0x9f9   :  { %v1162_v22 = vmul.f32 %v1160_v21, %v1156_v50 }
 0x9fb   :  { %1164 = vrot.lane.b32.xlu0 %v1162_v22, %s3529_s9 }
 0xa67   :  { %v1068_v25 = vpop.permute.xlu1 %1067 }
 0xa68   :  { %v3934_v26 = vadd.f32 %v1068_v25, %v1060_v24 }
 0xa6a   :  { %3379 = vtanh.f32 %v3934_v26 }
 0xa6d   :  { %v1165_v31 = vpop.permute.xlu0 %1164 }
 0xa6e   :  { %v3938_v32 = vadd.f32 %v1165_v31, %v1157_v27 }
 0xa70   :  { %3381 = vtanh.f32 %v3938_v32 }
 0xa77   :  { %v3380_v39 = vpop.eup %3379 }
 0xa78   :  { %1073 = vrot.lane.b32.xlu1 %v3380_v39, %s3528_s22 }
 0xa7d   :  { %v3382_v43 = vpop.eup %3381 }
 0xa7e   :  { %1170 = vrot.lane.b32.xlu0 %v3382_v43, %s3528_s22 }
 0xaea   :  { %v1074_v44 = vpop.permute.xlu1 %1073 }
 0xaeb   :  { %v1076_v28 = vmul.f32 %v1074_v44, %v1059_v17 }
 0xaed   :  { %1250 = vrot.lane.b32.xlu1 %v1076_v28, %s3529_s9 }
 0xaf0   :  { %v1171_v29 = vpop.permute.xlu0 %1170 }
 0xaf1   :  { %v1173_v46 = vmul.f32 %v1171_v29, %v1156_v50 }
 0xaf3   :  { %1175 = vrot.lane.b32.xlu0 %v1173_v46, %s3529_s9 }
 0xb5f   :  { %v1251_v38 = vpop.permute.xlu1 %1250 }
 0xb60   :  { %3117 = vmatmul.mubr.msk.f32.vlgmr.msra.gmra.mxu1 %vm250_vm5, %v1251_v38 }
 0xb61   :  { %3131 = vmatpush3.msra.mxu1 %v3686_v33  ;;  %3138 = vmatprep.mubr.msk.f32.mxu1 %vm3527_vm0, %v3526_v0 }
 0xb62   :  { %3132 = vmatprep.subr.mxu1 %v3526_v0 }
 0xb63   :  { %3133 = vmatpush3.msra.mxu1 %v3696_v35 }
 0xb64   :  { %3134 = vmatprep.subr.mxu1 %v3526_v0 }
 0xb65   :  { %v1176_v47 = vpop.permute.xlu0 %1175  ;;  %3135 = vmatpush3.msra.mxu1 %v3708_v37 }
 0xb66   :  { %3106 = vmatmul.mubr.msk.f32.vlgmr.msra.gmra.mxu0 %vm250_vm5, %v1176_v47  ;;  %3136 = vmatprep.subr.mxu1 %v3526_v0 }
 0xb67   :  { %3120 = vmatpush3.msra.mxu0 %v3618_v2  ;;  %3127 = vmatprep.mubr.msk.f32.mxu0 %vm3527_vm0, %v3526_v0 }
 0xb68   :  { %3121 = vmatprep.subr.mxu0 %v3526_v0  ;;  %3137 = vmatpush3.msra.mxu1 %v3730_v41 }
 0xb69   :  { %3122 = vmatpush3.msra.mxu0 %v3627_v4  ;;  %3152 = vmatprep.subr.mxu1 %v3526_v0 }
 0xb6a   :  { %3123 = vmatprep.subr.mxu0 %v3526_v0 }
 0xb6b   :  { %3124 = vmatpush3.msra.mxu0 %v3640_v7 }
 0xb6c   :  { %3125 = vmatprep.subr.mxu0 %v3526_v0 }
 0xb6d   :  { %3126 = vmatpush3.msra.mxu0 %v3648_v8 }
 0xb6e   :  { %3128 = vmatmul.mubr.msk.f32.vlgmr.msra.gmra.mxu0 %vm250_vm5, %v1176_v47  ;;  %3141 = vmatprep.subr.mxu0 %v3526_v0 }
 0xb6f   :  { %3142 = vmatpush3.msra.mxu0 %v3703_v36  ;;  %3149 = vmatprep.mubr.msk.f32.mxu0 %vm3527_vm0, %v3526_v0 }
 0xb70   :  { %3143 = vmatprep.subr.mxu0 %v3526_v0 }
 0xb71   :  { %3144 = vmatpush3.msra.mxu0 %v3723_v40 }
 0xb72   :  { %3145 = vmatprep.subr.mxu0 %v3526_v0 }
 0xb73   :  { %3146 = vmatpush3.msra.mxu0 %v3737_v42 }
 0xb74   :  { %3147 = vmatprep.subr.mxu0 %v3526_v0 }
 0xb75   :  { %3148 = vmatpush3.msra.mxu0 %v3756_v45 }
 0xb76   :  { %3163 = vmatprep.subr.mxu0 %v3526_v0 }
 0xc20   :  { %v1320_v34 = vpop.f32.mrf.mxu1 }
 0xc22   :  { %v3118_v30 = vpop.f32.mrf.mxu1 }
 0xc26   :  { %v1245_v48 = vpop.f32.mrf.mxu0 }
 0xc27   :  { %v1246_v55 = vadd.f32 %v3809_v57, %v1245_v48 }
 0xc28   :  { %v3107_v56 = vpop.f32.mrf.mxu0 }
 0xc29   :  { %v1324_v58 = vadd.f32 %v1320_v34, %v1246_v55  ;;  %v232_v34 = vadd.f32 %v3798_v51, %v3663_v10 }
 0xc2b   :  { %v2767_v59 = vmul.f32 -1.442695, %v1324_v58 }
 0xc2d   :  { %3383 = vpow2.f32 %v2767_v59 }
 0xc2e   :  { %v1417_v61 = vpop.f32.mrf.mxu0 }
 0xc2f   :  { %v1421_v62 = vadd.f32 %v1417_v61, %v227_v60 }
 0xc30   :  { %v3129_v63 = vpop.f32.mrf.mxu0 }
 0xc31   :  { %v2770_v1 = vmul.f32 -1.442695, %v1421_v62 }
 0xc33   :  { %3385 = vpow2.f32 %v2770_v1 }
 0xc3a   :  { %v3384_v3 = vpop.eup %3383 }
 0xc3b   :  { %v1328_v5 = vadd.f32 1.0, %v3384_v3 }
 0xc3d   :  { %3387 = vrcp.f32 %v1328_v5 }
 0xc40   :  { %v3386_v6 = vpop.eup %3385 }
 0xc41   :  { %v1425_v11 = vadd.f32 1.0, %v3386_v6 }
 0xc43   :  { %3389 = vrcp.f32 %v1425_v11 }
 0xc4a   :  { %v3388_v12 = vpop.eup %3387 }
 0xc4b   :  { %v1331_v13 = vmul.f32 2.0, %v3388_v12 }
 0xc4d   :  { %v2768_v14 = vadd.f32 -1.0, %v1331_v13 }
 0xc4f   :  { %v1333_v15 = vsel %vm3666_vm4, %v2768_v14, %v3388_v12 }
 0xc50   :  { %v3390_v16 = vpop.eup %3389  ;;  %1336 = vrot.lane.b32.xlu1 %v1333_v15, %s3528_s22  ;;  %v1334_v20 = vmul.f32 %v1333_v15, %v3934_v26 }
 0xc51   :  { %v1428_v52 = vmul.f32 2.0, %v3390_v16 }
 0xc53   :  { %v2771_v17 = vadd.f32 -1.0, %v1428_v52 }
 0xc55   :  { %v1430_v18 = vsel %vm3666_vm4, %v2771_v17, %v3390_v16 }
 0xc56   :  { %1433 = vrot.lane.b32.xlu0 %v1430_v18, %s3528_s22  ;;  %v1431_v24 = vmul.f32 %v1430_v18, %v3938_v32 }
 0xcc2   :  { %v1337_v49 = vpop.permute.xlu1 %1336 }
 0xcc3   :  { %v1339_v19 = vmul.f32 %v1337_v49, %v1333_v15 }
 0xcc5   :  { %1341 = vrot.lane.b32.xlu1 %v1339_v19, %s3529_s9 }
 0xcc8   :  { %v1434_v50 = vpop.permute.xlu0 %1433 }
 0xcc9   :  { %v1436_v9 = vmul.f32 %v1434_v50, %v1430_v18 }
 0xccb   :  { %1438 = vrot.lane.b32.xlu0 %v1436_v9, %s3529_s9 }
 0xd37   :  { %v1342_v21 = vpop.permute.xlu1 %1341 }
 0xd38   :  { %v3990_v22 = vadd.f32 %v1342_v21, %v1334_v20 }
 0xd3a   :  { %3391 = vtanh.f32 %v3990_v22 }
 0xd3d   :  { %v1439_v25 = vpop.permute.xlu0 %1438 }
 0xd3e   :  { %v3994_v27 = vadd.f32 %v1439_v25, %v1431_v24 }
 0xd40   :  { %3393 = vtanh.f32 %v3994_v27 }
 0xd47   :  { %v3392_v31 = vpop.eup %3391 }
 0xd48   :  { %1347 = vrot.lane.b32.xlu1 %v3392_v31, %s3528_s22 }
 0xd4d   :  { %v3394_v39 = vpop.eup %3393 }
 0xd4e   :  { %1444 = vrot.lane.b32.xlu0 %v3394_v39, %s3528_s22 }
 0xdba   :  { %v1348_v43 = vpop.permute.xlu1 %1347 }
 0xdbb   :  { %v1350_v26 = vmul.f32 %v1348_v43, %v1333_v15 }
 0xdbd   :  { %1524 = vrot.lane.b32.xlu1 %v1350_v26, %s3529_s9 }
 0xdc0   :  { %v1445_v44 = vpop.permute.xlu0 %1444 }
 0xdc1   :  { %v1447_v28 = vmul.f32 %v1445_v44, %v1430_v18 }
 0xdc3   :  { %1449 = vrot.lane.b32.xlu0 %v1447_v28, %s3529_s9 }
 0xe2f   :  { %v1525_v32 = vpop.permute.xlu1 %1524 }
 0xe30   :  { %3150 = vmatmul.mubr.msk.f32.vlgmr.msra.gmra.mxu0 %vm250_vm5, %v1525_v32 }
 0xe31   :  { %3164 = vmatpush3.msra.mxu0 %v3686_v33  ;;  %3171 = vmatprep.mubr.msk.f32.mxu0 %vm3527_vm0, %v3526_v0 }
 0xe32   :  { %3165 = vmatprep.subr.mxu0 %v3526_v0 }
 0xe33   :  { %3166 = vmatpush3.msra.mxu0 %v3696_v35 }
 0xe34   :  { %3167 = vmatprep.subr.mxu0 %v3526_v0 }
 0xe35   :  { %v1450_v29 = vpop.permute.xlu0 %1449  ;;  %3168 = vmatpush3.msra.mxu0 %v3708_v37 }
 0xe36   :  { %3139 = vmatmul.mubr.msk.f32.vlgmr.msra.gmra.mxu1 %vm250_vm5, %v1450_v29  ;;  %3169 = vmatprep.subr.mxu0 %v3526_v0 }
 0xe37   :  { %3153 = vmatpush3.msra.mxu1 %v3618_v2  ;;  %3160 = vmatprep.mubr.msk.f32.mxu1 %vm3527_vm0, %v3526_v0 }
 0xe38   :  { %3154 = vmatprep.subr.mxu1 %v3526_v0  ;;  %3170 = vmatpush3.msra.mxu0 %v3730_v41 }
 0xe39   :  { %3155 = vmatpush3.msra.mxu1 %v3627_v4  ;;  %3185 = vmatprep.subr.mxu0 %v3526_v0 }
 0xe3a   :  { %3156 = vmatprep.subr.mxu1 %v3526_v0 }
 0xe3b   :  { %3157 = vmatpush3.msra.mxu1 %v3640_v7 }
 0xe3c   :  { %3158 = vmatprep.subr.mxu1 %v3526_v0 }
 0xe3d   :  { %3159 = vmatpush3.msra.mxu1 %v3648_v8 }
 0xe3e   :  { %3161 = vmatmul.mubr.msk.f32.vlgmr.msra.gmra.mxu1 %vm250_vm5, %v1450_v29  ;;  %3174 = vmatprep.subr.mxu1 %v3526_v0 }
 0xe3f   :  { %3175 = vmatpush3.msra.mxu1 %v3703_v36  ;;  %3182 = vmatprep.mubr.msk.f32.mxu1 %vm3527_vm0, %v3526_v0 }
 0xe40   :  { %3176 = vmatprep.subr.mxu1 %v3526_v0 }
 0xe41   :  { %3177 = vmatpush3.msra.mxu1 %v3723_v40 }
 0xe42   :  { %3178 = vmatprep.subr.mxu1 %v3526_v0 }
 0xe43   :  { %3179 = vmatpush3.msra.mxu1 %v3737_v42 }
 0xe44   :  { %3180 = vmatprep.subr.mxu1 %v3526_v0 }
 0xe45   :  { %3181 = vmatpush3.msra.mxu1 %v3756_v45 }
 0xe46   :  { %3196 = vmatprep.subr.mxu1 %v3526_v0 }
 0xef0   :  { %v1594_v2 = vpop.f32.mrf.mxu0 }
 0xef2   :  { %v3151_v4 = vpop.f32.mrf.mxu0 }
 0xef6   :  { %v1519_v7 = vpop.f32.mrf.mxu1 }
 0xef7   :  { %v1520_v8 = vadd.f32 %v3809_v57, %v1519_v7 }
 0xef8   :  { %v3140_v46 = vpop.f32.mrf.mxu1 }
 0xef9   :  { %v1598_v38 = vadd.f32 %v1594_v2, %v1520_v8 }
 0xefb   :  { %v2774_v47 = vmul.f32 -1.442695, %v1598_v38 }
 0xefd   :  { %3395 = vpow2.f32 %v2774_v47 }
 0xefe   :  { %v1691_v30 = vpop.f32.mrf.mxu1 }
 0xeff   :  { %v1695_v48 = vadd.f32 %v1691_v30, %v232_v34 }
 0xf00   :  { %v3162_v55 = vpop.f32.mrf.mxu1 }
 0xf01   :  { %v2777_v56 = vmul.f32 -1.442695, %v1695_v48 }
 0xf03   :  { %3397 = vpow2.f32 %v2777_v56 }
 0xf0a   :  { %v3396_v58 = vpop.eup %3395 }
 0xf0b   :  { %v1602_v59 = vadd.f32 1.0, %v3396_v58 }
 0xf0d   :  { %3399 = vrcp.f32 %v1602_v59 }
 0xf10   :  { %v3398_v60 = vpop.eup %3397 }
 0xf11   :  { %v1699_v61 = vadd.f32 1.0, %v3398_v60 }
 0xf13   :  { %3401 = vrcp.f32 %v1699_v61 }
 0xf1a   :  { %v3400_v62 = vpop.eup %3399 }
 0xf1b   :  { %v1605_v63 = vmul.f32 2.0, %v3400_v62 }
 0xf1d   :  { %v2775_v1 = vadd.f32 -1.0, %v1605_v63 }
 0xf1f   :  { %v1607_v3 = vsel %vm3666_vm4, %v2775_v1, %v3400_v62 }
 0xf20   :  { %v3402_v5 = vpop.eup %3401  ;;  %1610 = vrot.lane.b32.xlu1 %v1607_v3, %s3528_s22  ;;  %v1608_v15 = vmul.f32 %v1607_v3, %v3990_v22 }
 0xf21   :  { %v1702_v10 = vmul.f32 2.0, %v3402_v5 }
 0xf23   :  { %v2778_v51 = vadd.f32 -1.0, %v1702_v10 }
 0xf25   :  { %v1704_v6 = vsel %vm3666_vm4, %v2778_v51, %v3402_v5 }
 0xf26   :  { %1707 = vrot.lane.b32.xlu0 %v1704_v6, %s3528_s22  ;;  %v1705_v17 = vmul.f32 %v1704_v6, %v3994_v27 }
 0xf92   :  { %v1611_v11 = vpop.permute.xlu1 %1610 }
 0xf93   :  { %v1613_v12 = vmul.f32 %v1611_v11, %v1607_v3 }
 0xf95   :  { %1615 = vrot.lane.b32.xlu1 %v1613_v12, %s3529_s9 }
 0xf98   :  { %v1708_v13 = vpop.permute.xlu0 %1707 }
 0xf99   :  { %v1710_v14 = vmul.f32 %v1708_v13, %v1704_v6 }
 0xf9b   :  { %1712 = vrot.lane.b32.xlu0 %v1710_v14, %s3529_s9  ;;  %v3448_v14 = vld [vmem:[%s4271_s4 + $0x18] sm:$0xff] }
0x1007   :  { %v1616_v16 = vpop.permute.xlu1 %1615 }
0x1008   :  { %v4046_v52 = vadd.f32 %v1616_v16, %v1608_v15  ;;  %v3449_v15 = vld [vmem:[%s4271_s4 + $0x10] sm:$0xff] }
0x100a   :  { %3403 = vtanh.f32 %v4046_v52 }
0x100d   :  { %v1713_v18 = vpop.permute.xlu0 %1712 }
0x100e   :  { %v4050_v49 = vadd.f32 %v1713_v18, %v1705_v17  ;;  %v3451_v17 = vld [vmem:[%s4271_s4] sm:$0xff]  ;;  %v3452_v18 = vld [vmem:[%s4272_s5 + $0x18] sm:$0xff] }
0x1010   :  { %3405 = vtanh.f32 %v4050_v49 }
0x1017   :  { %v3404_v19 = vpop.eup %3403 }
0x1018   :  { %1621 = vrot.lane.b32.xlu1 %v3404_v19, %s3528_s22  ;;  %v3454_v19 = vld [vmem:[%s4272_s5 + $0x8] sm:$0xff] }
0x101d   :  { %v3406_v50 = vpop.eup %3405 }
0x101e   :  { %1718 = vrot.lane.b32.xlu0 %v3406_v50, %s3528_s22  ;;  %v3455_v50 = vld [vmem:[%s4272_s5] sm:$0xff] }
0x108a   :  { %v1622_v9 = vpop.permute.xlu1 %1621 }
0x108b   :  { %v1624_v20 = vmul.f32 %v1622_v9, %v1607_v3 }
0x108d   :  { %1798 = vrot.lane.b32.xlu1 %v1624_v20, %s3529_s9 }
0x1090   :  { %v1719_v21 = vpop.permute.xlu0 %1718 }
0x1091   :  { %v1721_v22 = vmul.f32 %v1719_v21, %v1704_v6 }
0x1093   :  { %1723 = vrot.lane.b32.xlu0 %v1721_v22, %s3529_s9  ;;  %v3456_v22 = vld [vmem:[%s4273_s6] ss:$0 sm:$0xff] }
0x10ff   :  { %v1799_v24 = vpop.permute.xlu1 %1798 }
0x1100   :  { %3183 = vmatmul.mubr.msk.f32.vlgmr.msra.gmra.mxu1 %vm250_vm5, %v1799_v24 }
0x1101   :  { %3197 = vmatpush3.msra.mxu1 %v3686_v33  ;;  %3204 = vmatprep.mubr.msk.f32.mxu1 %vm3527_vm0, %v3526_v0  ;;  %v4070_v33 = vld [vmem:[%s4269_s2 + $0x18] sm:$0xff] }
0x1102   :  { %3198 = vmatprep.subr.mxu1 %v3526_v0 }
0x1103   :  { %3199 = vmatpush3.msra.mxu1 %v3696_v35  ;;  %v4080_v35 = vld [vmem:[%s4269_s2 + $0x10] sm:$0xff] }
0x1104   :  { %3200 = vmatprep.subr.mxu1 %v3526_v0 }
0x1105   :  { %v1724_v25 = vpop.permute.xlu0 %1723  ;;  %3201 = vmatpush3.msra.mxu1 %v3708_v37  ;;  %v4088_v37 = vld [vmem:[%s4269_s2 + $0x8] sm:$0xff] }
0x1106   :  { %3172 = vmatmul.mubr.msk.f32.vlgmr.msra.gmra.mxu0 %vm250_vm5, %v1724_v25  ;;  %3202 = vmatprep.subr.mxu1 %v3526_v0 }
0x1107   :  { %3186 = vmatpush3.msra.mxu0 %v4070_v33  ;;  %3193 = vmatprep.mubr.msk.f32.mxu0 %vm3527_vm0, %v3526_v0 }
0x1108   :  { %3187 = vmatprep.subr.mxu0 %v3526_v0  ;;  %3203 = vmatpush3.msra.mxu1 %v3730_v41  ;;  %v4095_v41 = vld [vmem:[%s4269_s2] sm:$0xff] }
0x1109   :  { %3188 = vmatpush3.msra.mxu0 %v4080_v35  ;;  %3218 = vmatprep.subr.mxu1 %v3526_v0 }
0x110a   :  { %3189 = vmatprep.subr.mxu0 %v3526_v0 }
0x110b   :  { %3190 = vmatpush3.msra.mxu0 %v4088_v37 }
0x110c   :  { %3191 = vmatprep.subr.mxu0 %v3526_v0 }
0x110d   :  { %3192 = vmatpush3.msra.mxu0 %v4095_v41 }
0x110e   :  { %3194 = vmatmul.mubr.msk.f32.vlgmr.msra.gmra.mxu0 %vm250_vm5, %v1724_v25  ;;  %3207 = vmatprep.subr.mxu0 %v3526_v0 }
0x110f   :  { %3208 = vmatpush3.msra.mxu0 %v3703_v36  ;;  %3215 = vmatprep.mubr.msk.f32.mxu0 %vm3527_vm0, %v3526_v0 }
0x1110   :  { %3209 = vmatprep.subr.mxu0 %v3526_v0 }
0x1111   :  { %3210 = vmatpush3.msra.mxu0 %v3723_v40  ;;  %v4114_v40 = vld [vmem:[%s4270_s3] ss:$0 sm:$0xff] }
0x1112   :  { %3211 = vmatprep.subr.mxu0 %v3526_v0 }
0x1113   :  { %3212 = vmatpush3.msra.mxu0 %v3737_v42  ;;  %v237_v42 = vadd.f32 %v4114_v40, %v3804_v54 }
0x1114   :  { %3213 = vmatprep.subr.mxu0 %v3526_v0 }
0x1115   :  { %3214 = vmatpush3.msra.mxu0 %v3756_v45 }
0x1116   :  { %3229 = vmatprep.subr.mxu0 %v3526_v0 }
0x11c0   :  { %v1868_v27 = vpop.f32.mrf.mxu1 }
0x11c2   :  { %v3184_v31 = vpop.f32.mrf.mxu1 }
0x11c6   :  { %v1793_v36 = vpop.f32.mrf.mxu0 }
0x11c7   :  { %v1794_v39 = vadd.f32 %v3809_v57, %v1793_v36 }
0x11c8   :  { %v3173_v43 = vpop.f32.mrf.mxu0 }
0x11c9   :  { %v1872_v26 = vadd.f32 %v1868_v27, %v1794_v39 }
0x11cb   :  { %v2781_v44 = vmul.f32 -1.442695, %v1872_v26 }
0x11cd   :  { %3407 = vpow2.f32 %v2781_v44 }
0x11ce   :  { %v1965_v45 = vpop.f32.mrf.mxu0 }
0x11cf   :  { %v1969_v28 = vadd.f32 %v1965_v45, %v237_v42 }
0x11d0   :  { %v3195_v32 = vpop.f32.mrf.mxu0 }
0x11d1   :  { %v2784_v29 = vmul.f32 -1.442695, %v1969_v28 }
0x11d3   :  { %3409 = vpow2.f32 %v2784_v29 }
0x11da   :  { %v3408_v2 = vpop.eup %3407 }
0x11db   :  { %v1876_v4 = vadd.f32 1.0, %v3408_v2 }
0x11dd   :  { %3411 = vrcp.f32 %v1876_v4 }
0x11e0   :  { %v3410_v57 = vpop.eup %3409 }
0x11e1   :  { %v1973_v7 = vadd.f32 1.0, %v3410_v57 }
0x11e3   :  { %3413 = vrcp.f32 %v1973_v7 }
0x11ea   :  { %v3412_v8 = vpop.eup %3411 }
0x11eb   :  { %v1879_v46 = vmul.f32 2.0, %v3412_v8 }
0x11ed   :  { %v2782_v38 = vadd.f32 -1.0, %v1879_v46 }
0x11ef   :  { %v1881_v47 = vsel %vm3666_vm4, %v2782_v38, %v3412_v8 }
0x11f0   :  { %v3414_v34 = vpop.eup %3413  ;;  %1884 = vrot.lane.b32.xlu1 %v1881_v47, %s3528_s22  ;;  %v1882_v60 = vmul.f32 %v1881_v47, %v4046_v52  ;;  %v3450_v52 = vld [vmem:[%s4271_s4 + $0x8] sm:$0xff] }
0x11f1   :  { %v1976_v54 = vmul.f32 2.0, %v3414_v34 }
0x11f3   :  { %v2785_v30 = vadd.f32 -1.0, %v1976_v54 }
0x11f5   :  { %v1978_v48 = vsel %vm3666_vm4, %v2785_v30, %v3414_v34 }
0x11f6   :  { %1981 = vrot.lane.b32.xlu0 %v1978_v48, %s3528_s22  ;;  %v1979_v63 = vmul.f32 %v1978_v48, %v4050_v49  ;;  %v3453_v49 = vld [vmem:[%s4272_s5 + $0x10] sm:$0xff] }
0x1262   :  { %v1885_v55 = vpop.permute.xlu1 %1884 }
0x1263   :  { %v1887_v56 = vmul.f32 %v1885_v55, %v1881_v47 }
0x1265   :  { %1889 = vrot.lane.b32.xlu1 %v1887_v56, %s3529_s9 }
0x1268   :  { %v1982_v58 = vpop.permute.xlu0 %1981 }
0x1269   :  { %v1984_v59 = vmul.f32 %v1982_v58, %v1978_v48 }
0x126b   :  { %1986 = vrot.lane.b32.xlu0 %v1984_v59, %s3529_s9 }
0x12d7   :  { %v1890_v61 = vpop.permute.xlu1 %1889 }
0x12d8   :  { %v4127_v62 = vadd.f32 %v1890_v61, %v1882_v60 }
0x12da   :  { %3415 = vtanh.f32 %v4127_v62 }
0x12dd   :  { %v1987_v1 = vpop.permute.xlu0 %1986 }
0x12de   :  { %v4131_v3 = vadd.f32 %v1987_v1, %v1979_v63 }
0x12e0   :  { %3417 = vtanh.f32 %v4131_v3 }
0x12e7   :  { %v3416_v5 = vpop.eup %3415 }
0x12e8   :  { %1895 = vrot.lane.b32.xlu1 %v3416_v5, %s3528_s22 }
0x12ed   :  { %v3418_v10 = vpop.eup %3417 }
0x12ee   :  { %1992 = vrot.lane.b32.xlu0 %v3418_v10, %s3528_s22 }
0x135a   :  { %v1896_v51 = vpop.permute.xlu1 %1895 }
0x135b   :  { %v1898_v6 = vmul.f32 %v1896_v51, %v1881_v47 }
0x135d   :  { %2072 = vrot.lane.b32.xlu1 %v1898_v6, %s3529_s9 }
0x1360   :  { %v1993_v11 = vpop.permute.xlu0 %1992 }
0x1361   :  { %v1995_v12 = vmul.f32 %v1993_v11, %v1978_v48 }
0x1363   :  { %1997 = vrot.lane.b32.xlu0 %v1995_v12, %s3529_s9 }
0x13cf   :  { %v2073_v13 = vpop.permute.xlu1 %2072 }
0x13d0   :  { %3216 = vmatmul.mubr.msk.f32.vlgmr.msra.gmra.mxu0 %vm250_vm5, %v2073_v13 }
0x13d1   :  { %3230 = vmatpush3.msra.mxu0 %v3448_v14  ;;  %3237 = vmatprep.mubr.msk.f32.mxu0 %vm3527_vm0, %v3526_v0 }
0x13d2   :  { %3231 = vmatprep.subr.mxu0 %v3526_v0 }
0x13d3   :  { %3232 = vmatpush3.msra.mxu0 %v3449_v15 }
0x13d4   :  { %3233 = vmatprep.subr.mxu0 %v3526_v0 }
0x13d5   :  { %v1998_v16 = vpop.permute.xlu0 %1997  ;;  %3234 = vmatpush3.msra.mxu0 %v3450_v52 }
0x13d6   :  { %3205 = vmatmul.mubr.msk.f32.vlgmr.msra.gmra.mxu1 %vm250_vm5, %v1998_v16  ;;  %3235 = vmatprep.subr.mxu0 %v3526_v0 }
0x13d7   :  { %3219 = vmatpush3.msra.mxu1 %v4070_v33  ;;  %3226 = vmatprep.mubr.msk.f32.mxu1 %vm3527_vm0, %v3526_v0 }
0x13d8   :  { %3220 = vmatprep.subr.mxu1 %v3526_v0  ;;  %3236 = vmatpush3.msra.mxu0 %v3451_v17 }
0x13d9   :  { %3221 = vmatpush3.msra.mxu1 %v4080_v35  ;;  %3251 = vmatprep.subr.mxu0 %v3526_v0 }
0x13da   :  { %3222 = vmatprep.subr.mxu1 %v3526_v0 }
0x13db   :  { %3223 = vmatpush3.msra.mxu1 %v4088_v37  ;;  %v242_v37 = vadd.f32 %v4114_v40, %v3802_v53 }
0x13dc   :  { %3224 = vmatprep.subr.mxu1 %v3526_v0 }
0x13dd   :  { %3225 = vmatpush3.msra.mxu1 %v4095_v41 }
0x13de   :  { %3227 = vmatmul.mubr.msk.f32.vlgmr.msra.gmra.mxu1 %vm250_vm5, %v1998_v16  ;;  %3240 = vmatprep.subr.mxu1 %v3526_v0 }
0x13df   :  { %3241 = vmatpush3.msra.mxu1 %v3452_v18  ;;  %3248 = vmatprep.mubr.msk.f32.mxu1 %vm3527_vm0, %v3526_v0 }
0x13e0   :  { %3242 = vmatprep.subr.mxu1 %v3526_v0 }
0x13e1   :  { %3243 = vmatpush3.msra.mxu1 %v3453_v49 }
0x13e2   :  { %3244 = vmatprep.subr.mxu1 %v3526_v0 }
0x13e3   :  { %3245 = vmatpush3.msra.mxu1 %v3454_v19 }
0x13e4   :  { %3246 = vmatprep.subr.mxu1 %v3526_v0 }
0x13e5   :  { %3247 = vmatpush3.msra.mxu1 %v3455_v50  ;;  %v2450_v50 = vld [vmem:[#allocation2 + $0x18] sm:$0xff] }
0x13e6   :  { %3262 = vmatprep.subr.mxu1 %v3526_v0 }
0x1490   :  { %v2142_v9 = vpop.f32.mrf.mxu0 }
0x1492   :  { %v3217_v20 = vpop.f32.mrf.mxu0 }
0x1493   :  { %v2448_v20 = vld [vmem:[#allocation2 + $0x8] sm:$0xff] }
0x1496   :  { %v2067_v21 = vpop.f32.mrf.mxu1 }
0x1497   :  { %v2068_v24 = vadd.f32 %v3456_v22, %v2067_v21 }
0x1498   :  { %v3206_v25 = vpop.f32.mrf.mxu1 }
0x1499   :  { %v2146_v33 = vadd.f32 %v2142_v9, %v2068_v24  ;;  %v2449_v9 = vld [vmem:[#allocation2 + $0x10] sm:$0xff]  ;;  %v2547_v25 = vld [vmem:[#allocation4 + $0x68] sm:$0xff] }
0x149a   :  { %v2548_v24 = vld [vmem:[#allocation4 + $0x70] sm:$0xff] }
0x149b   :  { %v2788_v35 = vmul.f32 -1.442695, %v2146_v33  ;;  %v2546_v33 = vld [vmem:[#allocation4 + $0x60] sm:$0xff] }
0x149d   :  { %3419 = vpow2.f32 %v2788_v35  ;;  %v2545_v35 = vld [vmem:[#allocation4 + $0x58] sm:$0xff] }
0x149e   :  { %v2239_v41 = vpop.f32.mrf.mxu1 }
0x149f   :  { %v2243_v27 = vadd.f32 %v2239_v41, %v242_v37  ;;  %v2544_v37 = vld [vmem:[#allocation4 + $0x50] sm:$0xff] }
0x14a0   :  { %v3228_v31 = vpop.f32.mrf.mxu1 }
0x14a1   :  { %v2791_v36 = vmul.f32 -1.442695, %v2243_v27  ;;  %v2543_v27 = vld [vmem:[#allocation4 + $0x48] sm:$0xff] }
0x14a3   :  { %3421 = vpow2.f32 %v2791_v36 }
0x14aa   :  { %v3420_v39 = vpop.eup %3419 }
0x14ab   :  { %v2150_v43 = vadd.f32 1.0, %v3420_v39  ;;  %v2542_v39 = vld [vmem:[#allocation4 + $0x40] sm:$0xff] }
0x14ad   :  { %3423 = vrcp.f32 %v2150_v43  ;;  %v2541_v43 = vld [vmem:[#allocation4 + $0x38] sm:$0xff] }
0x14b0   :  { %v3422_v26 = vpop.eup %3421 }
0x14b1   :  { %v2247_v44 = vadd.f32 1.0, %v3422_v26  ;;  %v2540_v26 = vld [vmem:[#allocation4 + $0x30] sm:$0xff] }
0x14b3   :  { %3425 = vrcp.f32 %v2247_v44  ;;  %v2539_v44 = vld [vmem:[#allocation4 + $0x28] sm:$0xff] }
0x14ba   :  { %v3424_v42 = vpop.eup %3423 }
0x14bb   :  { %v2153_v45 = vmul.f32 2.0, %v3424_v42 }
0x14bd   :  { %v2789_v28 = vadd.f32 -1.0, %v2153_v45  ;;  %v2537_v45 = vld [vmem:[#allocation4 + $0x18] sm:$0xff] }
0x14bf   :  { %v2155_v32 = vsel %vm3666_vm4, %v2789_v28, %v3424_v42  ;;  %v2538_v42 = vld [vmem:[#allocation4 + $0x20] sm:$0xff]  ;;  %v2536_v28 = vld [vmem:[#allocation4 + $0x10] sm:$0xff] }
0x14c0   :  { %v3426_v29 = vpop.eup %3425  ;;  %2158 = vrot.lane.b32.xlu1 %v2155_v32, %s3528_s22  ;;  %v2156_v46 = vmul.f32 %v2155_v32, %v4127_v62 }
0x14c1   :  { %v2250_v53 = vmul.f32 2.0, %v3426_v29 }
0x14c3   :  { %v2792_v40 = vadd.f32 -1.0, %v2250_v53  ;;  %v2797_v53 = vld [vmem:[%s4275_s8] ss:$0 sm:$0xff] }
0x14c5   :  { %v2252_v2 = vsel %vm3666_vm4, %v2792_v40, %v3426_v29  ;;  %v2534_v29 = vld [vmem:[#allocation4] sm:$0xff] }
0x14c6   :  { %2255 = vrot.lane.b32.xlu0 %v2252_v2, %s3528_s22  ;;  %v2253_v34 = vmul.f32 %v2252_v2, %v4131_v3 }
0x1532   :  { %v2159_v4 = vpop.permute.xlu1 %2158 }
0x1533   :  { %v2161_v57 = vmul.f32 %v2159_v4, %v2155_v32 }
0x1535   :  { %2163 = vrot.lane.b32.xlu1 %v2161_v57, %s3529_s9 }
0x1538   :  { %v2256_v7 = vpop.permute.xlu0 %2255 }
0x1539   :  { %v2258_v8 = vmul.f32 %v2256_v7, %v2252_v2  ;;  %v2648_v7 = vld [vmem:[#allocation6 + $0x78] sm:$0xff] }
0x153b   :  { %2260 = vrot.lane.b32.xlu0 %v2258_v8, %s3529_s9  ;;  %v2647_v8 = vld [vmem:[#allocation6 + $0x70] sm:$0xff] }
0x15a7   :  { %v2164_v38 = vpop.permute.xlu1 %2163 }
0x15a8   :  { %v2166_v47 = vadd.f32 %v2164_v38, %v2156_v46  ;;  %v2646_v46 = vld [vmem:[#allocation6 + $0x68] sm:$0xff]  ;;  %v2645_v38 = vld [vmem:[#allocation6 + $0x60] sm:$0xff] }
0x15aa   :  { %3427 = vtanh.f32 %v2166_v47 }
0x15ad   :  { %v2261_v54 = vpop.permute.xlu0 %2260 }
0x15ae   :  { %v2263_v30 = vadd.f32 %v2261_v54, %v2253_v34  ;;  %v2643_v34 = vld [vmem:[#allocation6 + $0x50] sm:$0xff]  ;;  %v2642_v54 = vld [vmem:[#allocation6 + $0x48] sm:$0xff] }
0x15b0   :  { %3429 = vtanh.f32 %v2263_v30  ;;  %v2641_v30 = vld [vmem:[#allocation6 + $0x40] sm:$0xff] }
0x15b7   :  { %v3428_v48 = vpop.eup %3427 }
0x15b8   :  { %2169 = vrot.lane.b32.xlu1 %v3428_v48, %s3528_s22  ;;  %v2640_v48 = vld [vmem:[#allocation6 + $0x38] sm:$0xff] }
0x15bd   :  { %v3430_v55 = vpop.eup %3429 }
0x15be   :  { %2266 = vrot.lane.b32.xlu0 %v3430_v55, %s3528_s22  ;;  %v2639_v55 = vld [vmem:[#allocation6 + $0x30] sm:$0xff] }
0x162a   :  { %v2170_v56 = vpop.permute.xlu1 %2169 }
0x162b   :  { %v2172_v58 = vmul.f32 %v2170_v56, %v2155_v32  ;;  %v2535_v32 = vld [vmem:[#allocation4 + $0x8] sm:$0xff] }
0x162c   :  { %v2638_v56 = vld [vmem:[#allocation6 + $0x28] sm:$0xff] }
0x162d   :  { %2346 = vrot.lane.b32.xlu1 %v2172_v58, %s3529_s9  ;;  %v2637_v58 = vld [vmem:[#allocation6 + $0x20] sm:$0xff] }
0x1630   :  { %v2267_v59 = vpop.permute.xlu0 %2266 }
0x1631   :  { %v2269_v60 = vmul.f32 %v2267_v59, %v2252_v2  ;;  %v2636_v59 = vld [vmem:[#allocation6 + $0x18] sm:$0xff] }
0x1633   :  { %2271 = vrot.lane.b32.xlu0 %v2269_v60, %s3529_s9  ;;  %v2635_v60 = vld [vmem:[#allocation6 + $0x10] sm:$0xff] }
0x169f   :  { %v2347_v61 = vpop.permute.xlu1 %2346 }
0x16a0   :  { %3249 = vmatmul.mubr.msk.f32.vlgmr.msra.gmra.mxu1 %vm250_vm5, %v2347_v61  ;;  %v2634_v61 = vld [vmem:[#allocation6 + $0x8] sm:$0xff] }
0x16a1   :  { %3294 = vmatprep.mubr.msk.f32.mxu1 %vm3527_vm0, %v3526_v0 }
0x16a5   :  { %v2272_v62 = vpop.permute.xlu0 %2271 }
0x16a6   :  { %3238 = vmatmul.mubr.msk.f32.vlgmr.msra.gmra.mxu0 %vm250_vm5, %v2272_v62  ;;  %v2633_v62 = vld [vmem:[#allocation6] sm:$0xff] }
0x16a7   :  { %3259 = vmatprep.mubr.msk.f32.mxu0 %vm3527_vm0, %v3526_v0  ;;  %3252 = vmatpush3.msra.mxu0 %v2450_v50 }
0x16a8   :  { %3253 = vmatprep.subr.mxu0 %v3526_v0 }
0x16a9   :  { %3254 = vmatpush3.msra.mxu0 %v2449_v9 }
0x16aa   :  { %3255 = vmatprep.subr.mxu0 %v3526_v0 }
0x16ab   :  { %3256 = vmatpush3.msra.mxu0 %v2448_v20 }
0x16ac   :  { %3257 = vmatprep.subr.mxu0 %v3526_v0 }
0x16ad   :  { %3258 = vmatpush3.msra.mxu0 %v2447_v23 }
0x16ae   :  { %3297 = vmatprep.subr.mxu0 %v3526_v0 }
0x1760   :  { %v2416_v63 = vpop.f32.mrf.mxu1 }
0x1762   :  { %v3250_v1 = vpop.f32.mrf.mxu1 }
0x1766   :  { %v2341_v3 = vpop.f32.mrf.mxu0 }
0x1767   :  { %v2342_v5 = vadd.f32 %v3456_v22, %v2341_v3  ;;  %v2549_v22 = vld [vmem:[#allocation4 + $0x78] sm:$0xff] }
0x1768   :  { %v3239_v10 = vpop.f32.mrf.mxu0  ;;  %3263 = vmatpush3.msra.mxu1 %v2549_v22 }
0x1769   :  { %v2420_v51 = vadd.f32 %v2416_v63, %v2342_v5  ;;  %3264 = vmatprep.subr.mxu1 %v3526_v0  ;;  %v2799_v63 = vld [vmem:[%s4277_s10] ss:$0 sm:$0xff] }
0x176a   :  { %3265 = vmatpush3.msra.mxu1 %v2548_v24 }
0x176b   :  { %v2795_v6 = vmul.f32 -1.442695, %v2420_v51  ;;  %3266 = vmatprep.subr.mxu1 %v3526_v0 }
0x176c   :  { %3267 = vmatpush3.msra.mxu1 %v2547_v25 }
0x176d   :  { %3431 = vpow2.f32 %v2795_v6  ;;  %3268 = vmatprep.subr.mxu1 %v3526_v0 }
0x176e   :  { %3269 = vmatpush3.msra.mxu1 %v2546_v33 }
0x176f   :  { %3270 = vmatprep.subr.mxu1 %v3526_v0 }
0x1770   :  { %3271 = vmatpush3.msra.mxu1 %v2545_v35 }
0x1771   :  { %3272 = vmatprep.subr.mxu1 %v3526_v0 }
0x1772   :  { %3273 = vmatpush3.msra.mxu1 %v2544_v37 }
0x1773   :  { %3274 = vmatprep.subr.mxu1 %v3526_v0 }
0x1774   :  { %3275 = vmatpush3.msra.mxu1 %v2543_v27 }
0x1775   :  { %3276 = vmatprep.subr.mxu1 %v3526_v0 }
0x1776   :  { %3277 = vmatpush3.msra.mxu1 %v2542_v39 }
0x1777   :  { %3278 = vmatprep.subr.mxu1 %v3526_v0 }
0x1778   :  { %3279 = vmatpush3.msra.mxu1 %v2541_v43 }
0x1779   :  { %3280 = vmatprep.subr.mxu1 %v3526_v0 }
0x177a   :  { %v3432_v11 = vpop.eup %3431  ;;  %3281 = vmatpush3.msra.mxu1 %v2540_v26 }
0x177b   :  { %v2424_v12 = vadd.f32 1.0, %v3432_v11  ;;  %3282 = vmatprep.subr.mxu1 %v3526_v0 }
0x177c   :  { %3283 = vmatpush3.msra.mxu1 %v2539_v44 }
0x177d   :  { %3433 = vrcp.f32 %v2424_v12  ;;  %3284 = vmatprep.subr.mxu1 %v3526_v0  ;;  %v2801_v12 = vld [vmem:[%s4279_s12] ss:$0 sm:$0xff] }
0x177e   :  { %3285 = vmatpush3.msra.mxu1 %v2538_v42 }
0x177f   :  { %3286 = vmatprep.subr.mxu1 %v3526_v0 }
0x1780   :  { %3287 = vmatpush3.msra.mxu1 %v2537_v45 }
0x1781   :  { %3288 = vmatprep.subr.mxu1 %v3526_v0 }
0x1782   :  { %3289 = vmatpush3.msra.mxu1 %v2536_v28 }
0x1783   :  { %3290 = vmatprep.subr.mxu1 %v3526_v0 }
0x1784   :  { %3291 = vmatpush3.msra.mxu1 %v2535_v32 }
0x1785   :  { %3292 = vmatprep.subr.mxu1 %v3526_v0 }
0x1786   :  { %3293 = vmatpush3.msra.mxu1 %v2534_v29 }
0x178a   :  { %v3434_v13 = vpop.eup %3433 }
0x178b   :  { %v2427_v14 = vmul.f32 2.0, %v3434_v13 }
0x178d   :  { %v2796_v15 = vadd.f32 -1.0, %v2427_v14 }
0x178f   :  { %v2429_v16 = vsel %vm3666_vm4, %v2796_v15, %v3434_v13 }
0x1790   :  { %2432 = vrot.lane.b32.xlu0 %v2429_v16, %s3528_s22  ;;  %v2430_v18 = vmul.f32 %v2429_v16, %v2166_v47  ;;  %v2644_v47 = vld [vmem:[#allocation6 + $0x58] sm:$0xff] }
0x1802   :  { %v2433_v52 = vpop.permute.xlu0 %2432 }
0x1803   :  { %v2435_v17 = vmul.f32 %v2433_v52, %v2429_v16 }
0x1805   :  { %2437 = vrot.lane.b32.xlu1 %v2435_v17, %s3529_s9 }
0x1877   :  { %v2438_v49 = vpop.permute.xlu1 %2437 }
0x1878   :  { %v2440_v19 = vadd.f32 %v2438_v49, %v2430_v18 }
0x187a   :  { %3435 = vtanh.f32 %v2440_v19 }
0x1887   :  { %v3436_v21 = vpop.eup %3435 }
0x1888   :  { %2443 = vrot.lane.b32.xlu0 %v3436_v21, %s3528_s22 }
0x18fa   :  { %v2444_v41 = vpop.permute.xlu0 %2443 }
0x18fb   :  { %v2446_v31 = vmul.f32 %v2444_v41, %v2429_v16 }
0x18fd   :  { %2459 = vrot.lane.b32.xlu1 %v2446_v31, %s3529_s9 }
0x196f   :  { %v2460_v36 = vpop.permute.xlu1 %2459 }
0x1970   :  { %3260 = vmatmul.mubr.msk.f32.vlgmr.msra.gmra.mxu0 %vm250_vm5, %v2460_v36 }
0x1971   :  { %3329 = vmatprep.mubr.msk.f32.mxu0 %vm3527_vm0, %v3526_v0  ;;  %3298 = vmatpush3.msra.mxu0 %v2648_v7 }
0x1972   :  { %3299 = vmatprep.subr.mxu0 %v3526_v0 }
0x1973   :  { %3300 = vmatpush3.msra.mxu0 %v2647_v8 }
0x1974   :  { %3301 = vmatprep.subr.mxu0 %v3526_v0 }
0x1975   :  { %3302 = vmatpush3.msra.mxu0 %v2646_v46 }
0x1976   :  { %3303 = vmatprep.subr.mxu0 %v3526_v0 }
0x1977   :  { %3304 = vmatpush3.msra.mxu0 %v2645_v38 }
0x1978   :  { %3305 = vmatprep.subr.mxu0 %v3526_v0 }
0x1979   :  { %3306 = vmatpush3.msra.mxu0 %v2644_v47 }
0x197a   :  { %3307 = vmatprep.subr.mxu0 %v3526_v0 }
0x197b   :  { %3308 = vmatpush3.msra.mxu0 %v2643_v34 }
0x197c   :  { %3309 = vmatprep.subr.mxu0 %v3526_v0 }
0x197d   :  { %3310 = vmatpush3.msra.mxu0 %v2642_v54 }
0x197e   :  { %3311 = vmatprep.subr.mxu0 %v3526_v0 }
0x197f   :  { %3312 = vmatpush3.msra.mxu0 %v2641_v30 }
0x1980   :  { %3313 = vmatprep.subr.mxu0 %v3526_v0 }
0x1981   :  { %3314 = vmatpush3.msra.mxu0 %v2640_v48 }
0x1982   :  { %3315 = vmatprep.subr.mxu0 %v3526_v0 }
0x1983   :  { %3316 = vmatpush3.msra.mxu0 %v2639_v55 }
0x1984   :  { %3317 = vmatprep.subr.mxu0 %v3526_v0 }
0x1985   :  { %3318 = vmatpush3.msra.mxu0 %v2638_v56 }
0x1986   :  { %3319 = vmatprep.subr.mxu0 %v3526_v0 }
0x1987   :  { %3320 = vmatpush3.msra.mxu0 %v2637_v58 }
0x1988   :  { %3321 = vmatprep.subr.mxu0 %v3526_v0 }
0x1989   :  { %3322 = vmatpush3.msra.mxu0 %v2636_v59 }
0x198a   :  { %3323 = vmatprep.subr.mxu0 %v3526_v0 }
0x198b   :  { %3324 = vmatpush3.msra.mxu0 %v2635_v60 }
0x198c   :  { %3325 = vmatprep.subr.mxu0 %v3526_v0 }
0x198d   :  { %3326 = vmatpush3.msra.mxu0 %v2634_v61 }
0x198e   :  { %3327 = vmatprep.subr.mxu0 %v3526_v0 }
0x198f   :  { %3328 = vmatpush3.msra.mxu0 %v2633_v62 }
0x1a30   :  { %v2529_v40 = vpop.f32.mrf.mxu0 }
0x1a31   :  { %v2530_v2 = vadd.f32 %v2797_v53, %v2529_v40 }
0x1a32   :  { %v3261_v4 = vpop.f32.mrf.mxu0 }
0x1a33   :  { %3437 = vtanh.f32 %v2530_v2 }
0x1a40   :  { %v3438_v57 = vpop.eup %3437 }
0x1a41   :  { %3295 = vmatmul.mubr.f32.vlgmr.msra.gmra.mxu1 %v3438_v57 }
0x1b01   :  { %v2623_v1 = vpop.f32.mrf.mxu1 }
0x1b02   :  { %v2624_v3 = vadd.f32 %v2799_v63, %v2623_v1 }
0x1b03   :  { %v3296_v5 = vpop.f32.mrf.mxu1 }
0x1b04   :  { %v2800_v10 = vmul.f32 -1.442695, %v2624_v3 }
0x1b06   :  { %3439 = vpow2.f32 %v2800_v10 }
0x1b13   :  { %v3440_v51 = vpop.eup %3439 }
0x1b14   :  { %v2630_v6 = vadd.f32 1.0, %v3440_v51 }
0x1b16   :  { %3441 = vrcp.f32 %v2630_v6 }
0x1b23   :  { %v3442_v11 = vpop.eup %3441 }
0x1b24   :  { %3330 = vmatmul.mubr.f32.vlgmr.msra.gmra.mxu0 %v3442_v11 }
0x1be4   :  { %v2722_v0 = vpop.f32.mrf.mxu0 }
0x1be5   :  { %v2723_v13 = vadd.f32 %v2801_v12, %v2722_v0 }
0x1be6   :  { %v3331_v14 = vpop.f32.mrf.mxu0 }
0x1be7   :  { %2726 = vst [vmem:[%s4280_s13] sm:$0xff] %v2723_v13 }
0x1be8   :  { %2731 = vsyncpa [#allocation3], 1 }
0x1be9   :  { %2732 = vsyncpa [#allocation5], 1 }

</bundles_post_ra>
